<compile_context>
chip_gen: v6e
topology: v6e:2x2x1
jax: 0.10.0
libtpu: 0.0.40
codegen_flags: <defaults>
</compile_context>

<pallas_src>
import functools

import jax
import jax.numpy as jnp
from jax import lax
from jax.experimental import pallas as pl
from jax.experimental.pallas import tpu as pltpu


# ------------------------------ Pallas kernels ------------------------------

def _mm_bias_act_kernel(x_ref, w_ref, b_ref, o_ref, *, relu):
    # bf16 x bf16 -> f32 accumulation on the MXU; bias (+ReLU) epilogue on VPU.
    y = jnp.dot(x_ref[...], w_ref[...], preferred_element_type=jnp.float32)
    y = y + b_ref[...]
    if relu:
        y = jnp.maximum(y, 0.0)
    o_ref[...] = y.astype(o_ref.dtype)


def matmul_bias_act(x, w, bias, relu=False, tm=256):
    """y = maybe_relu(x @ w + bias).

    x: (M, K) f32, w: (K, N) f32 (BN scale already folded in), bias: (N,).
    Operands are cast to bf16 (f32 accumulation).  Full-K / full-N blocks;
    only M is tiled (>=2 M-blocks at real sizes -> both v7x TensorCores busy).
    """
    M, K = x.shape
    Kw, N = w.shape
    assert K == Kw
    Mp = M
    if M < 8:                       # tiny matmuls (e.g. the 1x1 conv on the
        Mp = 8                      # GAP vector): pad rows to one sublane tile
        x = jnp.pad(x, ((0, Mp - M), (0, 0)))
    tm = Mp if Mp <= tm else tm
    grid_m = pl.cdiv(Mp, tm)

    out = pl.pallas_call(
        functools.partial(_mm_bias_act_kernel, relu=relu),
        out_shape=jax.ShapeDtypeStruct((Mp, N), jnp.float32),
        grid=(grid_m,),
        in_specs=[
            pl.BlockSpec((tm, K), lambda i: (i, 0)),
            pl.BlockSpec((K, N), lambda i: (0, 0)),   # resident across grid
            pl.BlockSpec((1, N), lambda i: (0, 0)),
        ],
        out_specs=pl.BlockSpec((tm, N), lambda i: (i, 0)),
        compiler_params=pltpu.CompilerParams(
            dimension_semantics=("parallel",)),
    )(x.astype(jnp.bfloat16), w.astype(jnp.bfloat16),
      bias.reshape(1, N).astype(jnp.float32))
    return out[:M] if Mp != M else out


def _gap_kernel(x_ref, o_ref):
    o_ref[...] = jnp.mean(x_ref[...], axis=1, keepdims=True)


def global_avg_pool(x):
    """Mean over H, W.  NHWC in -> (B, C) out."""
    B, H, W, C = x.shape
    S = H * W
    out = pl.pallas_call(
        _gap_kernel,
        out_shape=jax.ShapeDtypeStruct((B, 1, C), jnp.float32),
        grid=(B,),
        in_specs=[pl.BlockSpec((1, S, C), lambda b: (b, 0, 0))],
        out_specs=pl.BlockSpec((1, 1, C), lambda b: (b, 0, 0)),
        compiler_params=pltpu.CompilerParams(
            dimension_semantics=("parallel",)),
    )(x.reshape(B, S, C))
    return out.reshape(B, C)


def _merge_kernel(low_ref, up_ref, gp_ref, o_ref):
    # relu(low * gp + up); gp block is (1, 1, C), broadcast in-kernel.
    o_ref[...] = jnp.maximum(low_ref[...] * gp_ref[...] + up_ref[...], 0.0)


def fused_att_add_relu(low_mask, up, gp):
    """relu(low_mask * gp + up); low_mask/up NHWC, gp (B, C)."""
    B, H, W, C = low_mask.shape
    S = H * W
    # ~1 MiB per stream per block: 4 double-buffered streams stay well inside
    # v5e (16 MiB) / v6e (32 MiB) / v7x (32 MiB) scoped-VMEM defaults.
    ts = max(8, (1 << 20) // (4 * C) // 8 * 8)
    ts = S if S <= ts else ts
    out = pl.pallas_call(
        _merge_kernel,
        out_shape=jax.ShapeDtypeStruct((B, S, C), jnp.float32),
        grid=(B, pl.cdiv(S, ts)),
        in_specs=[
            pl.BlockSpec((1, ts, C), lambda b, s: (b, s, 0)),
            pl.BlockSpec((1, ts, C), lambda b, s: (b, s, 0)),
            pl.BlockSpec((1, 1, C), lambda b, s: (b, 0, 0)),
        ],
        out_specs=pl.BlockSpec((1, ts, C), lambda b, s: (b, s, 0)),
        compiler_params=pltpu.CompilerParams(
            dimension_semantics=("parallel", "parallel")),
    )(low_mask.reshape(B, S, C), up.reshape(B, S, C), gp.reshape(B, 1, C))
    return out.reshape(B, H, W, C)


# --------------------------- conv lowering (glue) ----------------------------

def bn_fold(bn, eps=1e-5):
    scale = bn['gamma'] / jnp.sqrt(bn['var'] + eps)
    bias = bn['beta'] - bn['mean'] * scale
    return scale, bias


def conv3x3_bn(x, weight, scale, bias):
    """3x3/stride-1/pad-1 conv (PyTorch weight (Cout,Cin,3,3)) + folded BN."""
    B, H, W, Cin = x.shape
    Cout = weight.shape[0]
    xp = jnp.pad(x, ((0, 0), (1, 1), (1, 1), (0, 0)))
    taps = [xp[:, dh:dh + H, dw:dw + W, :] for dh in range(3) for dw in range(3)]
    cols = jnp.stack(taps, axis=3).reshape(B * H * W, 9 * Cin)
    wmat = jnp.transpose(weight, (2, 3, 1, 0)).reshape(9 * Cin, Cout)
    wmat = wmat * scale[None, :]                  # fold BN scale into weights
    y = matmul_bias_act(cols, wmat, bias, relu=False)
    return y.reshape(B, H, W, Cout)


def conv1x1_bn_act(x, weight, scale, bias, relu=False):
    """1x1 conv (PyTorch weight (Cout,Cin,1,1)) + folded BN (+ ReLU)."""
    B, H, W, Cin = x.shape
    Cout = weight.shape[0]
    wmat = jnp.transpose(weight[:, :, 0, 0], (1, 0)) * scale[None, :]
    y = matmul_bias_act(x.reshape(B * H * W, Cin), wmat, bias, relu=relu)
    return y.reshape(B, H, W, Cout)


# per output phase r (and s): tuple of (padded-input offset, kernel index)
_CT_TAPS = {0: ((0, 3), (1, 1)), 1: ((1, 2), (2, 0))}


def conv_transpose2d_bn(x, weight, scale, bias):
    """ConvTranspose2d(k=4,s=2,p=1) (PyTorch weight (Cin,Cout,4,4)) + folded BN.

    Sub-pixel decomposition: each output phase (r, s) in {0,1}^2 is an exact
    2x2-tap matmul on the *undilated* input (no zero-dilation waste)."""
    B, H, W, Cin = x.shape
    Cout = weight.shape[1]
    xp = jnp.pad(x, ((0, 0), (1, 1), (1, 1), (0, 0)))
    rows = []
    for r in (0, 1):
        phase_s = []
        for s in (0, 1):
            taps, wcols = [], []
            for ho, kh in _CT_TAPS[r]:
                for wo, kw in _CT_TAPS[s]:
                    taps.append(xp[:, ho:ho + H, wo:wo + W, :])
                    wcols.append(weight[:, :, kh, kw])          # (Cin, Cout)
            cols = jnp.stack(taps, axis=3).reshape(B * H * W, 4 * Cin)
            wmat = jnp.stack(wcols, axis=0).reshape(4 * Cin, Cout)
            wmat = wmat * scale[None, :]
            y = matmul_bias_act(cols, wmat, bias, relu=False)
            phase_s.append(y.reshape(B, H, W, Cout))
        rows.append(jnp.stack(phase_s, axis=0))
    ph = jnp.stack(rows, axis=0)                                # (2,2,B,H,W,C)
    return jnp.transpose(ph, (2, 3, 0, 4, 1, 5)).reshape(B, 2 * H, 2 * W, Cout)


# ----------------------------------- GAU ------------------------------------

def gau_forward(params, fms_high, fms_low, upsample=True):
    """GAU forward.  fms_high / fms_low: NCHW; returns NCHW."""
    fh = jnp.transpose(fms_high, (0, 2, 3, 1)).astype(jnp.float32)
    fl = jnp.transpose(fms_low, (0, 2, 3, 1)).astype(jnp.float32)
    c_low = fl.shape[-1]

    # global-context gate: GAP over high-level map -> 1x1 conv -> ReLU
    gp = global_avg_pool(fh)                                    # (B, C_high)
    w1 = jnp.transpose(params['conv1x1'][:, :, 0, 0], (1, 0))   # (Ch, Cl)
    gp = matmul_bias_act(gp, w1, jnp.zeros((c_low,), jnp.float32), relu=True)

    # low-level mask branch: 3x3 conv + BN (no ReLU)
    low_mask = conv3x3_bn(fl, params['conv3x3'], *bn_fold(params['bn_low']))

    # high-level branch
    if upsample:
        up = conv_transpose2d_bn(fh, params['conv_upsample'],
                                 *bn_fold(params['bn_upsample']))
    else:
        up = conv1x1_bn_act(fh, params['conv_reduction'],
                            *bn_fold(params['bn_reduction']), relu=False)

    out = fused_att_add_relu(low_mask, up, gp)
    return jnp.transpose(out, (0, 3, 1, 2))


# ------------------------------ plain-JAX reference --------------------------

def _round_bf16(a):
    return a.astype(jnp.bfloat16).astype(jnp.float32)


def gau_reference(params, fms_high, fms_low, upsample=True):
    """XLA reference (operands pre-rounded to bf16 to mirror the kernels)."""
    dn = ('NHWC', 'HWIO', 'NHWC')
    hi = lax.Precision.HIGHEST
    fh = jnp.transpose(fms_high, (0, 2, 3, 1)).astype(jnp.float32)
    fl = jnp.transpose(fms_low, (0, 2, 3, 1)).astype(jnp.float32)

    gp = jnp.mean(fh, axis=(1, 2), keepdims=True)               # (B,1,1,Ch)
    w1 = jnp.transpose(params['conv1x1'][:, :, 0, 0], (1, 0))
    gp = jnp.maximum(jnp.einsum('bhwc,cd->bhwd', _round_bf16(gp),
                                _round_bf16(w1), precision=hi), 0.0)

    sc, bi = bn_fold(params['bn_low'])
    w3 = jnp.transpose(params['conv3x3'], (2, 3, 1, 0)) * sc[None, None, None, :]
    low = lax.conv_general_dilated(_round_bf16(fl), _round_bf16(w3),
                                   window_strides=(1, 1),
                                   padding=((1, 1), (1, 1)),
                                   dimension_numbers=dn, precision=hi) + bi

    if upsample:
        scu, biu = bn_fold(params['bn_upsample'])
        wt = params['conv_upsample'] * scu[None, :, None, None]
        w_up = jnp.transpose(wt[:, :, ::-1, ::-1], (2, 3, 0, 1))
        up = lax.conv_general_dilated(_round_bf16(fh), _round_bf16(w_up),
                                      window_strides=(1, 1),
                                      padding=((2, 2), (2, 2)),
                                      lhs_dilation=(2, 2),
                                      dimension_numbers=dn, precision=hi) + biu
    else:
        scu, biu = bn_fold(params['bn_reduction'])
        wr = jnp.transpose(params['conv_reduction'][:, :, 0, 0], (1, 0)) * scu[None, :]
        up = jnp.einsum('bhwc,cd->bhwd', _round_bf16(fh), _round_bf16(wr),
                        precision=hi) + biu

    out = jnp.maximum(low * gp + up, 0.0)
    return jnp.transpose(out, (0, 3, 1, 2))


# ------------------------------ parameter init -------------------------------

def _bn_params(key, c):
    k1, k2, k3, k4 = jax.random.split(key, 4)
    return dict(gamma=1.0 + 0.1 * jax.random.normal(k1, (c,), jnp.float32),
                beta=0.1 * jax.random.normal(k2, (c,), jnp.float32),
                mean=0.1 * jax.random.normal(k3, (c,), jnp.float32),
                var=1.0 + 0.1 * jax.random.uniform(k4, (c,), jnp.float32))


def init_gau_params(key, channels_high, channels_low, upsample=True):
    ks = jax.random.split(key, 6)
    p = dict(
        conv3x3=0.05 * jax.random.normal(
            ks[0], (channels_low, channels_low, 3, 3), jnp.float32),
        bn_low=_bn_params(ks[1], channels_low),
        conv1x1=0.05 * jax.random.normal(
            ks[2], (channels_low, channels_high, 1, 1), jnp.float32),
    )
    if upsample:
        p['conv_upsample'] = 0.05 * jax.random.normal(
            ks[3], (channels_high, channels_low, 4, 4), jnp.float32)
        p['bn_upsample'] = _bn_params(ks[4], channels_low)
    else:
        p['conv_reduction'] = 0.05 * jax.random.normal(
            ks[3], (channels_low, channels_high, 1, 1), jnp.float32)
        p['bn_reduction'] = _bn_params(ks[4], channels_low)
    return p


# ----------------------------------- main ------------------------------------

if __name__ == "__main__":
    key = jax.random.PRNGKey(0)
    B, C_high, C_low = 2, 64, 32
    Hh = Wh = 8                                   # low-level map is 16x16
    kp, kh_, kl_ = jax.random.split(key, 3)
    params = init_gau_params(kp, C_high, C_low, upsample=True)
    fms_high = jax.random.normal(kh_, (B, C_high, Hh, Wh), jnp.float32)
    fms_low = jax.random.normal(kl_, (B, C_low, 2 * Hh, 2 * Wh), jnp.float32)

    fwd = jax.jit(functools.partial(gau_forward, upsample=True))
    out = fwd(params, fms_high, fms_low)
    jax.block_until_ready(out)
    assert out.shape == (B, C_low, 2 * Hh, 2 * Wh)

    ref = gau_reference(params, fms_high, fms_low, upsample=True)
    err = float(jnp.max(jnp.abs(out - ref)))
    assert err < 2e-2, f"max abs err vs reference: {err}"
    print("KERNEL_OK")
</pallas_src>

<mosaic_0001>
module attributes {stable_mosaic.version = 11 : i64} {
  func.func @_mm_bias_act_kernel(%arg0: i32, %arg1: memref<256x288xbf16, #tpu.memory_space<vmem>>, %arg2: memref<288x32xbf16, #tpu.memory_space<vmem>>, %arg3: memref<1x32xf32, #tpu.memory_space<vmem>>, %arg4: memref<256x32xf32, #tpu.memory_space<vmem>>) attributes {dimension_semantics = [#tpu.dimension_semantics<parallel>], iteration_bounds = array<i64: 2>, scalar_prefetch = 0 : i64, scratch_operands = 0 : i64, tpu.core_type = #tpu.core_type<tc>, window_params = [{transform_indices = @transform_0, window_bounds = array<i64: 256, 288>}, {pipeline_mode = #tpu.pipeline_mode<synchronous>, transform_indices = @transform_1, window_bounds = array<i64: 288, 32>}, {pipeline_mode = #tpu.pipeline_mode<synchronous>, transform_indices = @transform_2, window_bounds = array<i64: 1, 32>}, {transform_indices = @transform_3, window_bounds = array<i64: 256, 32>}]} {
    %c0 = arith.constant 0 : index
    %c0_0 = arith.constant 0 : index
    %0 = vector.load %arg1[%c0, %c0_0] : memref<256x288xbf16, #tpu.memory_space<vmem>>, vector<256x288xbf16>
    %c0_1 = arith.constant 0 : index
    %c0_2 = arith.constant 0 : index
    %1 = vector.load %arg2[%c0_1, %c0_2] : memref<288x32xbf16, #tpu.memory_space<vmem>>, vector<288x32xbf16>
    %cst = arith.constant dense<0.000000e+00> : vector<256x32xf32>
    %2 = tpu.matmul %0, %1, %cst {dimension_numbers = #tpu.dot_dimension_numbers<[1], [0], [0], [1], [0, 0, 1, 1], [], []>} : vector<256x288xbf16>, vector<288x32xbf16>, vector<256x32xf32> -> vector<256x32xf32>
    %c0_3 = arith.constant 0 : index
    %c0_4 = arith.constant 0 : index
    %3 = vector.load %arg3[%c0_3, %c0_4] : memref<1x32xf32, #tpu.memory_space<vmem>>, vector<1x32xf32>
    %4 = vector.broadcast %3 : vector<1x32xf32> to vector<256x32xf32>
    %5 = arith.addf %2, %4 : vector<256x32xf32>
    %c0_5 = arith.constant 0 : index
    %c0_6 = arith.constant 0 : index
    %6 = vector.load %arg4[%c0_5, %c0_6] : memref<256x32xf32, #tpu.memory_space<vmem>>, vector<256x32xf32>
    tpu.vector_store %arg4[%c0_5, %c0_6], %5 {strides = array<i32>} : memref<256x32xf32, #tpu.memory_space<vmem>>, vector<256x32xf32>,
    return
  }
  func.func @transform_0(%arg0: i32) -> (i32, i32) {
    %c0_i32 = arith.constant 0 : i32
    %c0_i32_0 = arith.constant 0 : i32
    return %arg0, %c0_i32 : i32, i32
  }
  func.func @transform_1(%arg0: i32) -> (i32, i32) {
    %c0_i32 = arith.constant 0 : i32
    %c0_i32_0 = arith.constant 0 : i32
    %c0_i32_1 = arith.constant 0 : i32
    return %c0_i32, %c0_i32_0 : i32, i32
  }
  func.func @transform_2(%arg0: i32) -> (i32, i32) {
    %c0_i32 = arith.constant 0 : i32
    %c0_i32_0 = arith.constant 0 : i32
    %c0_i32_1 = arith.constant 0 : i32
    return %c0_i32, %c0_i32_0 : i32, i32
  }
  func.func @transform_3(%arg0: i32) -> (i32, i32) {
    %c0_i32 = arith.constant 0 : i32
    %c0_i32_0 = arith.constant 0 : i32
    return %arg0, %c0_i32 : i32, i32
  }
}

module attributes {stable_mosaic.version = 11 : i64} {
  func.func @_mm_bias_act_kernel(%arg0: i32, %arg1: memref<128x256xbf16, #tpu.memory_space<vmem>>, %arg2: memref<256x32xbf16, #tpu.memory_space<vmem>>, %arg3: memref<1x32xf32, #tpu.memory_space<vmem>>, %arg4: memref<128x32xf32, #tpu.memory_space<vmem>>) attributes {dimension_semantics = [#tpu.dimension_semantics<parallel>], iteration_bounds = array<i64: 1>, scalar_prefetch = 0 : i64, scratch_operands = 0 : i64, tpu.core_type = #tpu.core_type<tc>, window_params = [{transform_indices = @transform_0, window_bounds = array<i64: 128, 256>}, {pipeline_mode = #tpu.pipeline_mode<synchronous>, transform_indices = @transform_1, window_bounds = array<i64: 256, 32>}, {pipeline_mode = #tpu.pipeline_mode<synchronous>, transform_indices = @transform_2, window_bounds = array<i64: 1, 32>}, {transform_indices = @transform_3, window_bounds = array<i64: 128, 32>}]} {
    %c0 = arith.constant 0 : index
    %c0_0 = arith.constant 0 : index
    %0 = vector.load %arg1[%c0, %c0_0] : memref<128x256xbf16, #tpu.memory_space<vmem>>, vector<128x256xbf16>
    %c0_1 = arith.constant 0 : index
    %c0_2 = arith.constant 0 : index
    %1 = vector.load %arg2[%c0_1, %c0_2] : memref<256x32xbf16, #tpu.memory_space<vmem>>, vector<256x32xbf16>
    %cst = arith.constant dense<0.000000e+00> : vector<128x32xf32>
    %2 = tpu.matmul %0, %1, %cst {dimension_numbers = #tpu.dot_dimension_numbers<[1], [0], [0], [1], [0, 0, 1, 1], [], []>} : vector<128x256xbf16>, vector<256x32xbf16>, vector<128x32xf32> -> vector<128x32xf32>
    %c0_3 = arith.constant 0 : index
    %c0_4 = arith.constant 0 : index
    %3 = vector.load %arg3[%c0_3, %c0_4] : memref<1x32xf32, #tpu.memory_space<vmem>>, vector<1x32xf32>
    %4 = vector.broadcast %3 : vector<1x32xf32> to vector<128x32xf32>
    %5 = arith.addf %2, %4 : vector<128x32xf32>
    %c0_5 = arith.constant 0 : index
    %c0_6 = arith.constant 0 : index
    %6 = vector.load %arg4[%c0_5, %c0_6] : memref<128x32xf32, #tpu.memory_space<vmem>>, vector<128x32xf32>
    tpu.vector_store %arg4[%c0_5, %c0_6], %5 {strides = array<i32>} : memref<128x32xf32, #tpu.memory_space<vmem>>, vector<128x32xf32>,
    return
  }
  func.func @transform_0(%arg0: i32) -> (i32, i32) {
    %c0_i32 = arith.constant 0 : i32
    %c0_i32_0 = arith.constant 0 : i32
    return %arg0, %c0_i32 : i32, i32
  }
  func.func @transform_1(%arg0: i32) -> (i32, i32) {
    %c0_i32 = arith.constant 0 : i32
    %c0_i32_0 = arith.constant 0 : i32
    %c0_i32_1 = arith.constant 0 : i32
    return %c0_i32, %c0_i32_0 : i32, i32
  }
  func.func @transform_2(%arg0: i32) -> (i32, i32) {
    %c0_i32 = arith.constant 0 : i32
    %c0_i32_0 = arith.constant 0 : i32
    %c0_i32_1 = arith.constant 0 : i32
    return %c0_i32, %c0_i32_0 : i32, i32
  }
  func.func @transform_3(%arg0: i32) -> (i32, i32) {
    %c0_i32 = arith.constant 0 : i32
    %c0_i32_0 = arith.constant 0 : i32
    return %arg0, %c0_i32 : i32, i32
  }
}

module attributes {stable_mosaic.version = 11 : i64} {
  func.func @_gap_kernel(%arg0: i32, %arg1: memref<1x64x64xf32, #tpu.memory_space<vmem>>, %arg2: memref<1x1x64xf32, #tpu.memory_space<vmem>>) attributes {dimension_semantics = [#tpu.dimension_semantics<parallel>], iteration_bounds = array<i64: 2>, scalar_prefetch = 0 : i64, scratch_operands = 0 : i64, tpu.core_type = #tpu.core_type<tc>, window_params = [{transform_indices = @transform_0, window_bounds = array<i64: 1, 64, 64>}, {transform_indices = @transform_1, window_bounds = array<i64: 1, 1, 64>}]} {
    %c0 = arith.constant 0 : index
    %c0_0 = arith.constant 0 : index
    %c0_1 = arith.constant 0 : index
    %0 = vector.load %arg1[%c0, %c0_0, %c0_1] : memref<1x64x64xf32, #tpu.memory_space<vmem>>, vector<1x64x64xf32>
    %cst = arith.constant dense<0.000000e+00> : vector<1x64xf32>
    %1 = vector.multi_reduction <add>, %0, %cst [1] : vector<1x64x64xf32> to vector<1x64xf32>
    %2 = vector.shape_cast %1 : vector<1x64xf32> to vector<1x1x64xf32>
    %cst_2 = arith.constant 6.400000e+01 : f32
    %3 = vector.broadcast %cst_2 : f32 to vector<1x1x64xf32>
    %4 = arith.divf %2, %3 : vector<1x1x64xf32>
    %c0_3 = arith.constant 0 : index
    %c0_4 = arith.constant 0 : index
    %c0_5 = arith.constant 0 : index
    %5 = vector.load %arg2[%c0_3, %c0_4, %c0_5] : memref<1x1x64xf32, #tpu.memory_space<vmem>>, vector<1x1x64xf32>
    tpu.vector_store %arg2[%c0_3, %c0_4, %c0_5], %4 {strides = array<i32>} : memref<1x1x64xf32, #tpu.memory_space<vmem>>, vector<1x1x64xf32>,
    return
  }
  func.func @transform_0(%arg0: i32) -> (i32, i32, i32) {
    %c0_i32 = arith.constant 0 : i32
    %c0_i32_0 = arith.constant 0 : i32
    %c0_i32_1 = arith.constant 0 : i32
    return %arg0, %c0_i32, %c0_i32_0 : i32, i32, i32
  }
  func.func @transform_1(%arg0: i32) -> (i32, i32, i32) {
    %c0_i32 = arith.constant 0 : i32
    %c0_i32_0 = arith.constant 0 : i32
    %c0_i32_1 = arith.constant 0 : i32
    return %arg0, %c0_i32, %c0_i32_0 : i32, i32, i32
  }
}

module attributes {stable_mosaic.version = 11 : i64} {
  func.func @_mm_bias_act_kernel(%arg0: i32, %arg1: memref<8x64xbf16, #tpu.memory_space<vmem>>, %arg2: memref<64x32xbf16, #tpu.memory_space<vmem>>, %arg3: memref<1x32xf32, #tpu.memory_space<vmem>>, %arg4: memref<8x32xf32, #tpu.memory_space<vmem>>) attributes {dimension_semantics = [#tpu.dimension_semantics<parallel>], iteration_bounds = array<i64: 1>, scalar_prefetch = 0 : i64, scratch_operands = 0 : i64, tpu.core_type = #tpu.core_type<tc>, window_params = [{transform_indices = @transform_0, window_bounds = array<i64: 8, 64>}, {pipeline_mode = #tpu.pipeline_mode<synchronous>, transform_indices = @transform_1, window_bounds = array<i64: 64, 32>}, {pipeline_mode = #tpu.pipeline_mode<synchronous>, transform_indices = @transform_2, window_bounds = array<i64: 1, 32>}, {transform_indices = @transform_3, window_bounds = array<i64: 8, 32>}]} {
    %c0 = arith.constant 0 : index
    %c0_0 = arith.constant 0 : index
    %0 = vector.load %arg1[%c0, %c0_0] : memref<8x64xbf16, #tpu.memory_space<vmem>>, vector<8x64xbf16>
    %c0_1 = arith.constant 0 : index
    %c0_2 = arith.constant 0 : index
    %1 = vector.load %arg2[%c0_1, %c0_2] : memref<64x32xbf16, #tpu.memory_space<vmem>>, vector<64x32xbf16>
    %cst = arith.constant dense<0.000000e+00> : vector<8x32xf32>
    %2 = tpu.matmul %0, %1, %cst {dimension_numbers = #tpu.dot_dimension_numbers<[1], [0], [0], [1], [0, 0, 1, 1], [], []>} : vector<8x64xbf16>, vector<64x32xbf16>, vector<8x32xf32> -> vector<8x32xf32>
    %c0_3 = arith.constant 0 : index
    %c0_4 = arith.constant 0 : index
    %3 = vector.load %arg3[%c0_3, %c0_4] : memref<1x32xf32, #tpu.memory_space<vmem>>, vector<1x32xf32>
    %4 = vector.broadcast %3 : vector<1x32xf32> to vector<8x32xf32>
    %5 = arith.addf %2, %4 : vector<8x32xf32>
    %cst_5 = arith.constant 0.000000e+00 : f32
    %6 = vector.broadcast %cst_5 : f32 to vector<8x32xf32>
    %7 = arith.maximumf %5, %6 : vector<8x32xf32>
    %c0_6 = arith.constant 0 : index
    %c0_7 = arith.constant 0 : index
    %8 = vector.load %arg4[%c0_6, %c0_7] : memref<8x32xf32, #tpu.memory_space<vmem>>, vector<8x32xf32>
    tpu.vector_store %arg4[%c0_6, %c0_7], %7 {strides = array<i32>} : memref<8x32xf32, #tpu.memory_space<vmem>>, vector<8x32xf32>,
    return
  }
  func.func @transform_0(%arg0: i32) -> (i32, i32) {
    %c0_i32 = arith.constant 0 : i32
    %c0_i32_0 = arith.constant 0 : i32
    return %arg0, %c0_i32 : i32, i32
  }
  func.func @transform_1(%arg0: i32) -> (i32, i32) {
    %c0_i32 = arith.constant 0 : i32
    %c0_i32_0 = arith.constant 0 : i32
    %c0_i32_1 = arith.constant 0 : i32
    return %c0_i32, %c0_i32_0 : i32, i32
  }
  func.func @transform_2(%arg0: i32) -> (i32, i32) {
    %c0_i32 = arith.constant 0 : i32
    %c0_i32_0 = arith.constant 0 : i32
    %c0_i32_1 = arith.constant 0 : i32
    return %c0_i32, %c0_i32_0 : i32, i32
  }
  func.func @transform_3(%arg0: i32) -> (i32, i32) {
    %c0_i32 = arith.constant 0 : i32
    %c0_i32_0 = arith.constant 0 : i32
    return %arg0, %c0_i32 : i32, i32
  }
}

module attributes {stable_mosaic.version = 11 : i64} {
  func.func @_merge_kernel(%arg0: i32, %arg1: i32, %arg2: memref<1x256x32xf32, #tpu.memory_space<vmem>>, %arg3: memref<1x256x32xf32, #tpu.memory_space<vmem>>, %arg4: memref<1x1x32xf32, #tpu.memory_space<vmem>>, %arg5: memref<1x256x32xf32, #tpu.memory_space<vmem>>) attributes {dimension_semantics = [#tpu.dimension_semantics<parallel>, #tpu.dimension_semantics<parallel>], iteration_bounds = array<i64: 2, 1>, scalar_prefetch = 0 : i64, scratch_operands = 0 : i64, tpu.core_type = #tpu.core_type<tc>, window_params = [{transform_indices = @transform_0, window_bounds = array<i64: 1, 256, 32>}, {transform_indices = @transform_1, window_bounds = array<i64: 1, 256, 32>}, {transform_indices = @transform_2, window_bounds = array<i64: 1, 1, 32>}, {transform_indices = @transform_3, window_bounds = array<i64: 1, 256, 32>}]} {
    %c0 = arith.constant 0 : index
    %c0_0 = arith.constant 0 : index
    %c0_1 = arith.constant 0 : index
    %0 = vector.load %arg2[%c0, %c0_0, %c0_1] : memref<1x256x32xf32, #tpu.memory_space<vmem>>, vector<1x256x32xf32>
    %c0_2 = arith.constant 0 : index
    %c0_3 = arith.constant 0 : index
    %c0_4 = arith.constant 0 : index
    %1 = vector.load %arg4[%c0_2, %c0_3, %c0_4] : memref<1x1x32xf32, #tpu.memory_space<vmem>>, vector<1x1x32xf32>
    %2 = vector.broadcast %1 : vector<1x1x32xf32> to vector<1x256x32xf32>
    %3 = arith.mulf %0, %2 : vector<1x256x32xf32>
    %c0_5 = arith.constant 0 : index
    %c0_6 = arith.constant 0 : index
    %c0_7 = arith.constant 0 : index
    %4 = vector.load %arg3[%c0_5, %c0_6, %c0_7] : memref<1x256x32xf32, #tpu.memory_space<vmem>>, vector<1x256x32xf32>
    %5 = arith.addf %3, %4 : vector<1x256x32xf32>
    %cst = arith.constant 0.000000e+00 : f32
    %6 = vector.broadcast %cst : f32 to vector<1x256x32xf32>
    %7 = arith.maximumf %5, %6 : vector<1x256x32xf32>
    %c0_8 = arith.constant 0 : index
    %c0_9 = arith.constant 0 : index
    %c0_10 = arith.constant 0 : index
    %8 = vector.load %arg5[%c0_8, %c0_9, %c0_10] : memref<1x256x32xf32, #tpu.memory_space<vmem>>, vector<1x256x32xf32>
    tpu.vector_store %arg5[%c0_8, %c0_9, %c0_10], %7 {strides = array<i32>} : memref<1x256x32xf32, #tpu.memory_space<vmem>>, vector<1x256x32xf32>,
    return
  }
  func.func @transform_0(%arg0: i32, %arg1: i32) -> (i32, i32, i32) {
    %c0_i32 = arith.constant 0 : i32
    %c0_i32_0 = arith.constant 0 : i32
    return %arg0, %arg1, %c0_i32 : i32, i32, i32
  }
  func.func @transform_1(%arg0: i32, %arg1: i32) -> (i32, i32, i32) {
    %c0_i32 = arith.constant 0 : i32
    %c0_i32_0 = arith.constant 0 : i32
    return %arg0, %arg1, %c0_i32 : i32, i32, i32
  }
  func.func @transform_2(%arg0: i32, %arg1: i32) -> (i32, i32, i32) {
    %c0_i32 = arith.constant 0 : i32
    %c0_i32_0 = arith.constant 0 : i32
    %c0_i32_1 = arith.constant 0 : i32
    return %arg0, %c0_i32, %c0_i32_0 : i32, i32, i32
  }
  func.func @transform_3(%arg0: i32, %arg1: i32) -> (i32, i32, i32) {
    %c0_i32 = arith.constant 0 : i32
    %c0_i32_0 = arith.constant 0 : i32
    return %arg0, %arg1, %c0_i32 : i32, i32, i32
  }
}

</mosaic_0001>

<bundles_post_ra>
// kernel: gau_forward.10
= control target key start
LH: loop header
LB: loop body
LE: loop exit
PB: predicated region body
PF: predicated region fallthrough
CT: control target
= control target key end

     0   :  { %s1487_s12 = smov 0   ;;  %s1767_s0 = inlined_call_operand.vmem [shape: bf16[512,288], index: 0, kind: input, shape index: {}]   ;;  %s1768_s1 = inlined_call_operand.vmem [shape: bf16[288,32], index: 1, kind: input, shape index: {}]   ;;  %s1769_s2 = inlined_call_operand.vmem [shape: f32[1,32], index: 2, kind: input, shape index: {}]   ;;  %s1770_s3 = inlined_call_operand.vmem [shape: f32[512,32], index: 3, kind: output, shape index: {}]  }
   0x1 LB: > { %s1092_s13 = sadd.s32 4294967295, %s1465_s12   ;;  %p1096_p0 = scmp.ge.s32.totalorder %s1465_s12, 1  ;;  %s1465_s12 = sphi %s1487_s12, %s13_s12  }
   0x2   : > { %p139_p1 = scmp.lt.s32.totalorder %s1465_s12, 3 }
   0x4   : > { %p140_p2 = pnand %p1096_p0, %p139_p1 }
   0x5   : > { %s1097_s16 = sshll.u32 (!%p140_p2), %s1092_s13, 5 }
   0x6   : > { %143 = sbr.rel (%p140_p2) target bundleno = 338 (0x152), region = 32  ;;  %p165_p3 = scmp.lt.s32.totalorder (!%p140_p2), %s1097_s16, 63 }
   0xb   : > { %v1377_v0 = vld [vmem:[%s1768_s1 + $0x78] sm:$0xff]   ;;  %v1379_v2 = vld [vmem:[%s1768_s1 + $0x70] sm:$0xff]   ;;  %v1381_v4 = vld [vmem:[%s1768_s1 + $0x68] sm:$0xff]   ;;  %s1772_s16 = smov (!%p165_p3, %s1097_s16), 63  ;;  %vm633_vm0 = vcmask 261120  }
   0xc   : > { %v1378_v1 = vld [vmem:[%s1768_s1 + $0x38] sm:$0xff]   ;;  %1186 = vmatprep.subr.bf16.mxu0 %v1377_v0  ;;  %1352 = vmatprep.subr.bf16.mxu1 %v1377_v0  ;;  %v1380_v3 = vld [vmem:[%s1768_s1 + $0x30] sm:$0xff]   ;;  %v1382_v5 = vld [vmem:[%s1768_s1 + $0x28] sm:$0xff]   ;;  %s1368_s29 = smul.u32 12, %s1772_s16  ;;  %s1100_s30 = sshll.u32 %s1772_s16, 3 }
   0xd   : > { %1187 = vmatpush3.bf16.msra.mxu0 %v1378_v1  ;;  %1360 = vmatpush3.bf16.msra.mxu1 %v1378_v1  ;;  %v1383_v6 = vld [vmem:[%s1768_s1 + $0x60] sm:$0xff]   ;;  %v1385_v8 = vld [vmem:[%s1768_s1 + $0x58] sm:$0xff]   ;;  %v1387_v10 = vld [vmem:[%s1768_s1 + $0x50] sm:$0xff]   ;;  %s1651_s8 = scalar_lea.vmem %s1770_s3, %s1100_s30 }
   0xe   : > { %1188 = vmatprep.subr.bf16.mxu0 %v1379_v2  ;;  %1353 = vmatprep.subr.bf16.mxu1 %v1379_v2  ;;  %v1384_v7 = vld [vmem:[%s1768_s1 + $0x20] sm:$0xff]   ;;  %s1528_s9 = scalar_lea.vmem %s1767_s0, %s1368_s29  ;;  %v1386_v9 = vld [vmem:[%s1768_s1 + $0x18] sm:$0xff]   ;;  %v1388_v13 = vld [vmem:[%s1768_s1 + $0x10] sm:$0xff]  }
   0xf   : > { %v1395_v11 = vld [vmem:[%s1528_s9 + $0x4] ss:$12 sps:$4 sm:$0xff]   ;;  %v1389_v14 = vld [vmem:[%s1768_s1 + $0x48] sm:$0xff]   ;;  %v1406_v26 = vld [vmem:[%s1528_s9 + $0x34] ss:$12 sps:$4 sm:$0xff]  }
  0x10   : > { %v1398_v12 = vld [vmem:[%s1528_s9 + $0x124] ss:$12 sps:$4 sm:$0xff]   ;;  %714 = vmatprep.mubr.bf16.mxu0 %v1395_v11  ;;  %v1390_v15 = vld [vmem:[%s1768_s1 + $0x8] sm:$0xff]   ;;  %v1408_v27 = vld [vmem:[%s1528_s9 + $0x154] ss:$12 sps:$4 sm:$0xff]  }
  0x11   : > { %1189 = vmatpush3.bf16.msra.mxu0 %v1380_v3  ;;  %1361 = vmatpush3.bf16.msra.mxu1 %v1380_v3  ;;  %v1391_v16 = vld [vmem:[%s1768_s1 + $0x40] sm:$0xff]   ;;  %v1399_v18 = vld [vmem:[%s1768_s1 + $0x88] sm:$0xff]   ;;  %v1410_v28 = vld [vmem:[%s1528_s9 + $0x30] ss:$12 sps:$4 sm:$0xff]  }
  0x12   : > { %1190 = vmatprep.subr.bf16.mxu0 %v1381_v4  ;;  %1354 = vmatprep.subr.bf16.mxu1 %v1381_v4  ;;  %v1392_v17 = vld [vmem:[%s1768_s1] sm:$0xff]   ;;  %v1400_v21 = vld [vmem:[%s1528_s9 + $0x1c] ss:$12 sps:$4 sm:$0xff]   ;;  %v1413_v30 = vld [vmem:[%s1528_s9 + $0x4c] ss:$12 sps:$4 sm:$0xff]  }
  0x13   : > { %810 = vmatprep.mubr.bf16.mxu1 %v1398_v12  ;;  %v1393_v19 = vld [vmem:[%s1528_s9] ss:$12 sps:$4 sm:$0xff]   ;;  %v1402_v22 = vld [vmem:[%s1528_s9 + $0x13c] ss:$12 sps:$4 sm:$0xff]   ;;  %v1404_v24 = vld [vmem:[%s1528_s9 + $0x18] ss:$12 sps:$4 sm:$0xff]  }
  0x14   : > { %v1396_v20 = vld [vmem:[%s1528_s9 + $0x120] ss:$12 sps:$4 sm:$0xff]   ;;  %v1405_v25 = vld [vmem:[%s1528_s9 + $0x138] ss:$12 sps:$4 sm:$0xff]   ;;  %v1411_v29 = vld [vmem:[%s1528_s9 + $0x150] ss:$12 sps:$4 sm:$0xff]  }
  0x15   : > { %1191 = vmatpush3.bf16.msra.mxu0 %v1382_v5  ;;  %1362 = vmatpush3.bf16.msra.mxu1 %v1382_v5  ;;  %v1412_v23 = vld [vmem:[%s1768_s1 + $0x80] sm:$0xff]   ;;  %v1415_v31 = vld [vmem:[%s1528_s9 + $0x16c] ss:$12 sps:$4 sm:$0xff]   ;;  %v1417_v32 = vld [vmem:[%s1528_s9 + $0x48] ss:$12 sps:$4 sm:$0xff]  }
  0x16   : > { %1192 = vmatprep.subr.bf16.mxu0 %v1383_v6  ;;  %1355 = vmatprep.subr.bf16.mxu1 %v1383_v6  ;;  %v1418_v33 = vld [vmem:[%s1528_s9 + $0x168] ss:$12 sps:$4 sm:$0xff]   ;;  %v1419_v34 = vld [vmem:[%s1528_s9 + $0x64] ss:$12 sps:$4 sm:$0xff]   ;;  %v1422_v36 = vld [vmem:[%s1528_s9 + $0x60] ss:$12 sps:$4 sm:$0xff]  }
  0x17   : > { %v1421_v35 = vld [vmem:[%s1528_s9 + $0x8] ss:$12 sps:$4 sm:$0xff]   ;;  %v1423_v37 = vld [vmem:[%s1528_s9 + $0x20] ss:$12 sps:$4 sm:$0xff]   ;;  %v1426_v39 = vld [vmem:[%s1528_s9 + $0x38] ss:$12 sps:$4 sm:$0xff]  }
  0x18   : > { %v1424_v38 = vld [vmem:[%s1528_s9 + $0x7c] ss:$12 sps:$4 sm:$0xff]   ;;  %v1427_v40 = vld [vmem:[%s1528_s9 + $0x78] ss:$12 sps:$4 sm:$0xff]   ;;  %v1429_v42 = vld [vmem:[%s1528_s9 + $0x94] ss:$12 sps:$4 sm:$0xff]  }
  0x19   : > { %1193 = vmatpush3.bf16.msra.mxu0 %v1384_v7  ;;  %1363 = vmatpush3.bf16.msra.mxu1 %v1384_v7  ;;  %v1428_v41 = vld [vmem:[%s1528_s9 + $0x50] ss:$12 sps:$4 sm:$0xff]   ;;  %v1431_v43 = vld [vmem:[%s1528_s9 + $0x68] ss:$12 sps:$4 sm:$0xff]   ;;  %v1433_v45 = vld [vmem:[%s1528_s9 + $0x80] ss:$12 sps:$4 sm:$0xff]  }
  0x1a   : > { %1194 = vmatprep.subr.bf16.mxu0 %v1385_v8  ;;  %1356 = vmatprep.subr.bf16.mxu1 %v1385_v8  ;;  %v1432_v44 = vld [vmem:[%s1528_s9 + $0x90] ss:$12 sps:$4 sm:$0xff]   ;;  %v1434_v46 = vld [vmem:[%s1528_s9 + $0xac] ss:$12 sps:$4 sm:$0xff]   ;;  %v1437_v48 = vld [vmem:[%s1528_s9 + $0xa8] ss:$12 sps:$4 sm:$0xff]  }
  0x1b   : > { %v1436_v47 = vld [vmem:[%s1528_s9 + $0x98] ss:$12 sps:$4 sm:$0xff]   ;;  %v1438_v49 = vld [vmem:[%s1528_s9 + $0xb0] ss:$12 sps:$4 sm:$0xff]   ;;  %v1441_v51 = vld [vmem:[%s1528_s9 + $0xc8] ss:$12 sps:$4 sm:$0xff]  }
  0x1c   : > { %v1439_v50 = vld [vmem:[%s1528_s9 + $0xc4] ss:$12 sps:$4 sm:$0xff]   ;;  %v1442_v52 = vld [vmem:[%s1528_s9 + $0xc0] ss:$12 sps:$4 sm:$0xff]   ;;  %v1444_v54 = vld [vmem:[%s1528_s9 + $0xdc] ss:$12 sps:$4 sm:$0xff]  }
  0x1d   : > { %1195 = vmatpush3.bf16.msra.mxu0 %v1386_v9  ;;  %1364 = vmatpush3.bf16.msra.mxu1 %v1386_v9  ;;  %v1443_v53 = vld [vmem:[%s1528_s9 + $0xe0] ss:$12 sps:$4 sm:$0xff]   ;;  %v1446_v55 = vld [vmem:[%s1528_s9 + $0xf8] ss:$12 sps:$4 sm:$0xff]   ;;  %v1448_v57 = vld [vmem:[%s1528_s9 + $0x110] ss:$12 sps:$4 sm:$0xff]  }
  0x1e   : > { %1196 = vmatprep.subr.bf16.mxu0 %v1387_v10  ;;  %1357 = vmatprep.subr.bf16.mxu1 %v1387_v10  ;;  %v1447_v56 = vld [vmem:[%s1528_s9 + $0xd8] ss:$12 sps:$4 sm:$0xff]   ;;  %v1449_v58 = vld [vmem:[%s1528_s9 + $0xf4] ss:$12 sps:$4 sm:$0xff]   ;;  %v1452_v60 = vld [vmem:[%s1528_s9 + $0xf0] ss:$12 sps:$4 sm:$0xff]  }
  0x1f   : > { %v1451_v59 = vld [vmem:[%s1528_s9 + $0x128] ss:$12 sps:$4 sm:$0xff]   ;;  %v1453_v61 = vld [vmem:[%s1528_s9 + $0x140] ss:$12 sps:$4 sm:$0xff]   ;;  %v1456_v63 = vld [vmem:[%s1528_s9 + $0x158] ss:$12 sps:$4 sm:$0xff]  }
  0x20   : > { %v1454_v62 = vld [vmem:[%s1528_s9 + $0x10c] ss:$12 sps:$4 sm:$0xff]   ;;  %v1457_v0 = vld [vmem:[%s1528_s9 + $0x108] ss:$12 sps:$4 sm:$0xff]   ;;  %v1458_v1 = vld [vmem:[%s1528_s9 + $0x170] ss:$12 sps:$4 sm:$0xff]  }
  0x21   : > { %1197 = vmatpush3.bf16.msra.mxu0 %v1388_v13  ;;  %1365 = vmatpush3.bf16.msra.mxu1 %v1388_v13 }
  0x22   : > { %1198 = vmatprep.subr.bf16.mxu0 %v1389_v14  ;;  %1358 = vmatprep.subr.bf16.mxu1 %v1389_v14 }
  0x25   : > { %1199 = vmatpush3.bf16.msra.mxu0 %v1390_v15  ;;  %1366 = vmatpush3.bf16.msra.mxu1 %v1390_v15 }
  0x26   : > { %1200 = vmatprep.subr.bf16.mxu0 %v1391_v16  ;;  %1359 = vmatprep.subr.bf16.mxu1 %v1391_v16 }
  0x29   : > { %1201 = vmatpush3.bf16.msra.mxu0 %v1392_v17  ;;  %1367 = vmatpush3.bf16.msra.mxu1 %v1392_v17 }
  0x2a   : > { %1316 = vmatprep.subr.bf16.mxu1 %v1399_v18 }
  0x2c   : > { %715 = vmatmul.mubr.bf16.vlgmr.msra.gmra.mxu0 %v1393_v19  ;;  %811 = vmatmul.mubr.bf16.vlgmr.msra.gmra.mxu1 %v1396_v20 }
  0x2d   : > { %1317 = vmatpush3.bf16.msra.mxu1 %v1399_v18  ;;  %722 = vmatprep.mubr.bf16.mxu0 %v1400_v21 }
  0x2e   : > { %818 = vmatprep.mubr.bf16.mxu1 %v1402_v22  ;;  %1318 = vmatprep.subr.bf16.mxu1 %v1412_v23 }
  0x31   : > { %1319 = vmatpush3.bf16.msra.mxu1 %v1412_v23 }
  0x34   : > { %723 = vmatmul.mubr.bf16.gmra.mxu0 %v1404_v24  ;;  %819 = vmatmul.mubr.bf16.gmra.mxu1 %v1405_v25 }
  0x35   : > { %730 = vmatprep.mubr.bf16.mxu0 %v1406_v26  ;;  %826 = vmatprep.mubr.bf16.mxu1 %v1408_v27 }
  0x3c   : > { %731 = vmatmul.mubr.bf16.gmra.mxu0 %v1410_v28  ;;  %827 = vmatmul.mubr.bf16.gmra.mxu1 %v1411_v29 }
  0x3d   : > { %738 = vmatprep.mubr.bf16.mxu0 %v1413_v30  ;;  %834 = vmatprep.mubr.bf16.mxu1 %v1415_v31 }
  0x44   : > { %739 = vmatmul.mubr.bf16.gmra.mxu0 %v1417_v32  ;;  %835 = vmatmul.mubr.bf16.gmra.mxu1 %v1418_v33 }
  0x45   : > { %746 = vmatprep.mubr.bf16.mxu0 %v1419_v34  ;;  %1320 = vmatprep.mubr.msk.bf16.mxu1 %vm633_vm0, %v1421_v35 }
  0x4c   : > { %747 = vmatmul.mubr.bf16.gmra.mxu0 %v1422_v36  ;;  %1321 = vmatmul.mubr.msk.bf16.vlgmr.msra.gmra.mxu1 %vm633_vm0, %v1423_v37 }
  0x4d   : > { %754 = vmatprep.mubr.bf16.mxu0 %v1424_v38  ;;  %1324 = vmatprep.mubr.msk.bf16.mxu1 %vm633_vm0, %v1426_v39 }
  0x54   : > { %755 = vmatmul.mubr.bf16.gmra.mxu0 %v1427_v40  ;;  %1325 = vmatmul.mubr.msk.bf16.gmra.mxu1 %vm633_vm0, %v1428_v41 }
  0x55   : > { %762 = vmatprep.mubr.bf16.mxu0 %v1429_v42  ;;  %1328 = vmatprep.mubr.msk.bf16.mxu1 %vm633_vm0, %v1431_v43  ;;  %v1645_v42 = vld [vmem:[%s1769_s2] ss:$0 sm:$0xff] }
  0x5c   : > { %763 = vmatmul.mubr.bf16.gmra.mxu0 %v1432_v44  ;;  %1329 = vmatmul.mubr.msk.bf16.gmra.mxu1 %vm633_vm0, %v1433_v45 }
  0x5d   : > { %770 = vmatprep.mubr.bf16.mxu0 %v1434_v46  ;;  %1332 = vmatprep.mubr.msk.bf16.mxu1 %vm633_vm0, %v1436_v47 }
  0x64   : > { %771 = vmatmul.mubr.bf16.gmra.mxu0 %v1437_v48  ;;  %1333 = vmatmul.mubr.msk.bf16.gmra.mxu1 %vm633_vm0, %v1438_v49 }
  0x65   : > { %778 = vmatprep.mubr.bf16.mxu0 %v1439_v50  ;;  %1336 = vmatprep.mubr.msk.bf16.mxu1 %vm633_vm0, %v1441_v51 }
  0x6c   : > { %779 = vmatmul.mubr.bf16.gmra.mxu0 %v1442_v52  ;;  %1337 = vmatmul.mubr.msk.bf16.gmra.mxu1 %vm633_vm0, %v1443_v53 }
  0x6d   : > { %786 = vmatprep.mubr.bf16.mxu0 %v1444_v54  ;;  %1340 = vmatprep.mubr.msk.bf16.mxu1 %vm633_vm0, %v1446_v55 }
  0x74   : > { %787 = vmatmul.mubr.bf16.gmra.mxu0 %v1447_v56  ;;  %1341 = vmatmul.mubr.msk.bf16.gmra.mxu1 %vm633_vm0, %v1448_v57 }
  0x75   : > { %794 = vmatprep.mubr.bf16.mxu0 %v1449_v58  ;;  %1344 = vmatprep.mubr.msk.bf16.mxu1 %vm633_vm0, %v1451_v59 }
  0x7c   : > { %795 = vmatmul.mubr.bf16.gmra.mxu0 %v1452_v60  ;;  %1345 = vmatmul.mubr.msk.bf16.gmra.mxu1 %vm633_vm0, %v1453_v61 }
  0x7d   : > { %802 = vmatprep.mubr.bf16.mxu0 %v1454_v62  ;;  %1348 = vmatprep.mubr.msk.bf16.mxu1 %vm633_vm0, %v1456_v63 }
  0x84   : > { %803 = vmatmul.mubr.bf16.gmra.mxu0 %v1457_v0  ;;  %1349 = vmatmul.mubr.msk.bf16.gmra.mxu1 %vm633_vm0, %v1458_v1 }
  0xec   : > { %v1202_v2 = vpop.f32.mrf.mxu0  ;;  %v1274_v3 = vpop.f32.mrf.mxu1 }
  0xee   : > { %v1203_v4 = vpop.f32.mrf.mxu0  ;;  %v1275_v5 = vpop.f32.mrf.mxu1 }
  0xef   : > { %v1621_v6 = vadd.f32 %v1275_v5, %v1274_v3  ;;  %v1204_v39 = vadd.f32 %v1203_v4, %v1202_v2 }
  0xf0   : > { %v1205_v7 = vpop.f32.mrf.mxu0  ;;  %v1277_v8 = vpop.f32.mrf.mxu1 }
  0xf1   : > { %v717_v49 = vadd.f32 %v1204_v39, %v1645_v42 }
  0xf2   : > { %v1206_v9 = vpop.f32.mrf.mxu0  ;;  %v1278_v10 = vpop.f32.mrf.mxu1 }
  0xf3   : > { %v1623_v11 = vadd.f32 %v1278_v10, %v1277_v8  ;;  %v1207_v47 = vadd.f32 %v1206_v9, %v1205_v7 }
  0xf4   : > { %v1208_v12 = vpop.f32.mrf.mxu0  ;;  %v1280_v13 = vpop.f32.mrf.mxu1 }
  0xf5   : > { %v720_v59 = vadd.f32 %v1207_v47, %v1645_v42 }
  0xf6   : > { %v1209_v14 = vpop.f32.mrf.mxu0  ;;  %v1281_v15 = vpop.f32.mrf.mxu1 }
  0xf7   : > { %v1625_v16 = vadd.f32 %v1281_v15, %v1280_v13  ;;  %v1210_v36 = vadd.f32 %v1209_v14, %v1208_v12 }
  0xf8   : > { %v1211_v17 = vpop.f32.mrf.mxu0  ;;  %v1283_v18 = vpop.f32.mrf.mxu1 }
  0xf9   : > { %v725_v44 = vadd.f32 %v1210_v36, %v1645_v42 }
  0xfa   : > { %v1212_v19 = vpop.f32.mrf.mxu0  ;;  %v1284_v20 = vpop.f32.mrf.mxu1 }
  0xfb   : > { %v1627_v21 = vadd.f32 %v1284_v20, %v1283_v18  ;;  %v1213_v43 = vadd.f32 %v1212_v19, %v1211_v17 }
  0xfc   : > { %v1214_v22 = vpop.f32.mrf.mxu0  ;;  %v1286_v23 = vpop.f32.mrf.mxu1 }
  0xfd   : > { %v728_v54 = vadd.f32 %v1213_v43, %v1645_v42 }
  0xfe   : > { %v1215_v24 = vpop.f32.mrf.mxu0  ;;  %v1287_v25 = vpop.f32.mrf.mxu1 }
  0xff   : > { %v1629_v26 = vadd.f32 %v1287_v25, %v1286_v23  ;;  %v1216_v57 = vadd.f32 %v1215_v24, %v1214_v22 }
 0x100   : > { %v1217_v27 = vpop.f32.mrf.mxu0  ;;  %v1289_v28 = vpop.f32.mrf.mxu1 }
 0x101   : > { %v733_v5 = vadd.f32 %v1216_v57, %v1645_v42 }
 0x102   : > { %v1218_v29 = vpop.f32.mrf.mxu0  ;;  %v1290_v30 = vpop.f32.mrf.mxu1 }
 0x103   : > { %v1631_v31 = vadd.f32 %v1290_v30, %v1289_v28  ;;  %v1219_v3 = vadd.f32 %v1218_v29, %v1217_v27 }
 0x104   : > { %v1220_v32 = vpop.f32.mrf.mxu0  ;;  %v1633_v33 = vpop.f32.mrf.mxu1 }
 0x105   : > { %v736_v18 = vadd.f32 %v1219_v3, %v1645_v42 }
 0x106   : > { %v1221_v34 = vpop.f32.mrf.mxu0  ;;  %v1635_v35 = vpop.f32.mrf.mxu1 }
 0x107   : > { %v1222_v52 = vadd.f32 %v1221_v34, %v1220_v32 }
 0x108   : > { %v1223_v37 = vpop.f32.mrf.mxu0  ;;  %v1637_v38 = vpop.f32.mrf.mxu1 }
 0x109   : > { %v741_v0 = vadd.f32 %v1222_v52, %v1645_v42 }
 0x10a   : > { %v1224_v40 = vpop.f32.mrf.mxu0  ;;  %v1640_v41 = vpop.f32.mrf.mxu1 }
 0x10b   : > { %v1225_v62 = vadd.f32 %v1224_v40, %v1223_v37 }
 0x10c   : > { %v1226_v45 = vpop.f32.mrf.mxu0  ;;  %v1322_v46 = vpop.f32.mrf.mxu1 }
 0x10d   : > { %v886_v48 = vadd.f32 %v1322_v46, %v725_v44  ;;  %v744_v12 = vadd.f32 %v1225_v62, %v1645_v42 }
 0x10e   : > { %v1227_v50 = vpop.f32.mrf.mxu0  ;;  %v877_v51 = vpop.f32.mrf.mxu1 }
 0x10f   : > { %1006 = vst.msk [vmem:[%s1651_s8 + $0x10] sm:$0xff] %vm633_vm0, %v886_v48  ;;  %v878_v53 = vadd.f32 %v877_v51, %v717_v49  ;;  %v1228_v15 = vadd.f32 %v1227_v50, %v1226_v45 }
 0x110   : > { %v1229_v55 = vpop.f32.mrf.mxu0  ;;  %v1323_v56 = vpop.f32.mrf.mxu1 }
 0x111   : > { %1004 = vst.msk [vmem:[%s1651_s8] sm:$0xff] %vm633_vm0, %v878_v53  ;;  %v889_v58 = vadd.f32 %v1323_v56, %v728_v54  ;;  %v749_v30 = vadd.f32 %v1228_v15, %v1645_v42 }
 0x112   : > { %v1230_v60 = vpop.f32.mrf.mxu0  ;;  %v880_v61 = vpop.f32.mrf.mxu1 }
 0x113   : > { %1007 = vst.msk [vmem:[%s1651_s8 + $0x18] sm:$0xff] %vm633_vm0, %v889_v58  ;;  %v881_v63 = vadd.f32 %v880_v61, %v720_v59  ;;  %v1231_v28 = vadd.f32 %v1230_v60, %v1229_v55 }
 0x114   : > { %v1232_v1 = vpop.f32.mrf.mxu0  ;;  %v1326_v2 = vpop.f32.mrf.mxu1 }
 0x115   : > { %1005 = vst.msk [vmem:[%s1651_s8 + $0x8] sm:$0xff] %vm633_vm0, %v881_v63  ;;  %v902_v4 = vadd.f32 %v1326_v2, %v741_v0  ;;  %v752_v45 = vadd.f32 %v1231_v28, %v1645_v42 }
 0x116   : > { %v1233_v7 = vpop.f32.mrf.mxu0  ;;  %v893_v8 = vpop.f32.mrf.mxu1 }
 0x117   : > { %1010 = vst.msk [vmem:[%s1651_s8 + $0x30] sm:$0xff] %vm633_vm0, %v902_v4  ;;  %v1234_v9 = vadd.f32 %v1233_v7, %v1232_v1  ;;  %v894_v10 = vadd.f32 %v893_v8, %v733_v5 }
 0x118   : > { %v1235_v13 = vpop.f32.mrf.mxu0  ;;  %v1327_v14 = vpop.f32.mrf.mxu1 }
 0x119   : > { %1008 = vst.msk [vmem:[%s1651_s8 + $0x20] sm:$0xff] %vm633_vm0, %v894_v10  ;;  %v905_v17 = vadd.f32 %v1327_v14, %v744_v12  ;;  %v757_v24 = vadd.f32 %v1234_v9, %v1645_v42 }
 0x11a   : > { %v1236_v19 = vpop.f32.mrf.mxu0  ;;  %v896_v20 = vpop.f32.mrf.mxu1 }
 0x11b   : > { %1011 = vst.msk [vmem:[%s1651_s8 + $0x38] sm:$0xff] %vm633_vm0, %v905_v17  ;;  %v1237_v22 = vadd.f32 %v1236_v19, %v1235_v13  ;;  %v897_v23 = vadd.f32 %v896_v20, %v736_v18 }
 0x11c   : > { %v1238_v25 = vpop.f32.mrf.mxu0  ;;  %v1330_v27 = vpop.f32.mrf.mxu1 }
 0x11d   : > { %1009 = vst.msk [vmem:[%s1651_s8 + $0x28] sm:$0xff] %vm633_vm0, %v897_v23  ;;  %v918_v29 = vadd.f32 %v1330_v27, %v757_v24  ;;  %v760_v37 = vadd.f32 %v1237_v22, %v1645_v42 }
 0x11e   : > { %v1239_v32 = vpop.f32.mrf.mxu0  ;;  %v909_v34 = vpop.f32.mrf.mxu1 }
 0x11f   : > { %1014 = vst.msk [vmem:[%s1651_s8 + $0x50] sm:$0xff] %vm633_vm0, %v918_v29  ;;  %v910_v36 = vadd.f32 %v909_v34, %v749_v30  ;;  %v1240_v43 = vadd.f32 %v1239_v32, %v1238_v25 }
 0x120   : > { %v1241_v39 = vpop.f32.mrf.mxu0  ;;  %v1331_v40 = vpop.f32.mrf.mxu1 }
 0x121   : > { %1012 = vst.msk [vmem:[%s1651_s8 + $0x40] sm:$0xff] %vm633_vm0, %v910_v36  ;;  %v921_v44 = vadd.f32 %v1331_v40, %v760_v37  ;;  %v765_v52 = vadd.f32 %v1240_v43, %v1645_v42 }
 0x122   : > { %v1242_v46 = vpop.f32.mrf.mxu0  ;;  %v912_v47 = vpop.f32.mrf.mxu1 }
 0x123   : > { %1015 = vst.msk [vmem:[%s1651_s8 + $0x58] sm:$0xff] %vm633_vm0, %v921_v44  ;;  %v913_v48 = vadd.f32 %v912_v47, %v752_v45  ;;  %v1243_v51 = vadd.f32 %v1242_v46, %v1241_v39  ;;  %v821_v39 = vadd.f32 %v1625_v16, %v1645_v42  ;;  %v813_v46 = vadd.f32 %v1621_v6, %v1645_v42 }
 0x124   : > { %v1244_v49 = vpop.f32.mrf.mxu0  ;;  %v1334_v50 = vpop.f32.mrf.mxu1  ;;  %v1294_v47 = vadd.f32 %v1635_v35, %v1633_v33  ;;  %v816_v35 = vadd.f32 %v1623_v11, %v1645_v42 }
 0x125   : > { %1013 = vst.msk [vmem:[%s1651_s8 + $0x48] sm:$0xff] %vm633_vm0, %v913_v48  ;;  %v768_v60 = vadd.f32 %v1243_v51, %v1645_v42 }
 0x126   : > { %v1245_v53 = vpop.f32.mrf.mxu0  ;;  %v925_v54 = vpop.f32.mrf.mxu1 }
 0x127   : > { %v1246_v55 = vadd.f32 %v1245_v53, %v1244_v49  ;;  %v926_v56 = vadd.f32 %v925_v54, %v765_v52  ;;  %v824_v52 = vadd.f32 %v1627_v21, %v1645_v42  ;;  %v1297_v21 = vadd.f32 %v1640_v41, %v1637_v38 }
 0x128   : > { %v1247_v57 = vpop.f32.mrf.mxu0  ;;  %v1335_v58 = vpop.f32.mrf.mxu1 }
 0x129   : > { %v773_v59 = vadd.f32 %v1246_v55, %v1645_v42  ;;  %1016 = vst.msk [vmem:[%s1651_s8 + $0x60] sm:$0xff] %vm633_vm0, %v926_v56 }
 0x12a   : > { %v1248_v61 = vpop.f32.mrf.mxu0  ;;  %v928_v62 = vpop.f32.mrf.mxu1 }
 0x12b   : > { %v934_v63 = vadd.f32 %v1334_v50, %v773_v59  ;;  %v1249_v0 = vadd.f32 %v1248_v61, %v1247_v57  ;;  %v929_v1 = vadd.f32 %v928_v62, %v768_v60  ;;  %v837_v57 = vadd.f32 %v1294_v47, %v1645_v42 }
 0x12c   : > { %v1250_v2 = vpop.f32.mrf.mxu0  ;;  %v1338_v3 = vpop.f32.mrf.mxu1 }
 0x12d   : > { %1018 = vst.msk [vmem:[%s1651_s8 + $0x70] sm:$0xff] %vm633_vm0, %v934_v63  ;;  %v776_v4 = vadd.f32 %v1249_v0, %v1645_v42  ;;  %1017 = vst.msk [vmem:[%s1651_s8 + $0x68] sm:$0xff] %vm633_vm0, %v929_v1  ;;  %v829_v0 = vadd.f32 %v1629_v26, %v1645_v42 }
 0x12e   : > { %v1251_v5 = vpop.f32.mrf.mxu0  ;;  %v941_v7 = vpop.f32.mrf.mxu1 }
 0x12f   : > { %v937_v8 = vadd.f32 %v1335_v58, %v776_v4  ;;  %v1252_v9 = vadd.f32 %v1251_v5, %v1250_v2  ;;  %v840_v4 = vadd.f32 %v1297_v21, %v1645_v42 }
 0x130   : > { %v1253_v10 = vpop.f32.mrf.mxu0  ;;  %v1339_v12 = vpop.f32.mrf.mxu1 }
 0x131   : > { %1019 = vst.msk [vmem:[%s1651_s8 + $0x78] sm:$0xff] %vm633_vm0, %v937_v8  ;;  %v781_v13 = vadd.f32 %v1252_v9, %v1645_v42  ;;  %v832_v9 = vadd.f32 %v1631_v31, %v1645_v42 }
 0x132   : > { %v1254_v14 = vpop.f32.mrf.mxu0  ;;  %v944_v15 = vpop.f32.mrf.mxu1 }
 0x133   : > { %v942_v17 = vadd.f32 %v941_v7, %v781_v13  ;;  %v1255_v18 = vadd.f32 %v1254_v14, %v1253_v10 }
 0x134   : > { %v1256_v19 = vpop.f32.mrf.mxu0  ;;  %v1701_v20 = vpop.f32.mrf.mxu1 }
 0x135   : > { %1020 = vst.msk [vmem:[%s1651_s8 + $0x80] sm:$0xff] %vm633_vm0, %v942_v17  ;;  %v784_v22 = vadd.f32 %v1255_v18, %v1645_v42 }
 0x136   : > { %v1257_v23 = vpop.f32.mrf.mxu0  ;;  %v957_v24 = vpop.f32.mrf.mxu1 }
 0x137   : > { %v945_v25 = vadd.f32 %v944_v15, %v784_v22  ;;  %v1258_v27 = vadd.f32 %v1257_v23, %v1256_v19 }
 0x138   : > { %v1259_v28 = vpop.f32.mrf.mxu0  ;;  %v1706_v29 = vpop.f32.mrf.mxu1 }
 0x139   : > { %1021 = vst.msk [vmem:[%s1651_s8 + $0x88] sm:$0xff] %vm633_vm0, %v945_v25  ;;  %v789_v30 = vadd.f32 %v1258_v27, %v1645_v42 }
 0x13a   : > { %v1260_v32 = vpop.f32.mrf.mxu0  ;;  %v960_v34 = vpop.f32.mrf.mxu1 }
 0x13b   : > { %v950_v36 = vadd.f32 %v1338_v3, %v789_v30  ;;  %v1261_v37 = vadd.f32 %v1260_v32, %v1259_v28 }
 0x13c   : > { %v1262_v40 = vpop.f32.mrf.mxu0  ;;  %v1346_v43 = vpop.f32.mrf.mxu1 }
 0x13d   : > { %1022 = vst.msk [vmem:[%s1651_s8 + $0x90] sm:$0xff] %vm633_vm0, %v950_v36  ;;  %v792_v44 = vadd.f32 %v1261_v37, %v1645_v42  ;;  %v982_v45 = vadd.f32 %v1346_v43, %v821_v39 }
 0x13e   : > { %v1263_v48 = vpop.f32.mrf.mxu0  ;;  %v973_v49 = vpop.f32.mrf.mxu1 }
 0x13f   : > { %v953_v50 = vadd.f32 %v1339_v12, %v792_v44  ;;  %1030 = vst.msk [vmem:[%s1651_s8 + $0xd0] sm:$0xff] %vm633_vm0, %v982_v45  ;;  %v1264_v16 = vadd.f32 %v1263_v48, %v1262_v40  ;;  %v974_v51 = vadd.f32 %v973_v49, %v813_v46 }
 0x140   : > { %v1265_v53 = vpop.f32.mrf.mxu0  ;;  %v1347_v54 = vpop.f32.mrf.mxu1 }
 0x141   : > { %1023 = vst.msk [vmem:[%s1651_s8 + $0x98] sm:$0xff] %vm633_vm0, %v953_v50  ;;  %v797_v6 = vadd.f32 %v1264_v16, %v1645_v42  ;;  %1028 = vst.msk [vmem:[%s1651_s8 + $0xc0] sm:$0xff] %vm633_vm0, %v974_v51  ;;  %v985_v33 = vadd.f32 %v1347_v54, %v824_v52 }
 0x142   : > { %v1266_v55 = vpop.f32.mrf.mxu0  ;;  %v976_v56 = vpop.f32.mrf.mxu1 }
 0x143   : > { %v958_v58 = vadd.f32 %v957_v24, %v797_v6  ;;  %1031 = vst.msk [vmem:[%s1651_s8 + $0xd8] sm:$0xff] %vm633_vm0, %v985_v33  ;;  %v1267_v59 = vadd.f32 %v1266_v55, %v1265_v53  ;;  %v977_v60 = vadd.f32 %v976_v56, %v816_v35 }
 0x144   : > { %v1268_v61 = vpop.f32.mrf.mxu0  ;;  %v1350_v62 = vpop.f32.mrf.mxu1 }
 0x145   : > { %1024 = vst.msk [vmem:[%s1651_s8 + $0xa0] sm:$0xff] %vm633_vm0, %v958_v58  ;;  %v800_v11 = vadd.f32 %v1267_v59, %v1645_v42  ;;  %1029 = vst.msk [vmem:[%s1651_s8 + $0xc8] sm:$0xff] %vm633_vm0, %v977_v60  ;;  %v998_v63 = vadd.f32 %v1350_v62, %v837_v57 }
 0x146   : > { %v1269_v38 = vpop.f32.mrf.mxu0  ;;  %v989_v41 = vpop.f32.mrf.mxu1 }
 0x147   : > { %v961_v1 = vadd.f32 %v960_v34, %v800_v11  ;;  %1034 = vst.msk [vmem:[%s1651_s8 + $0xf0] sm:$0xff] %vm633_vm0, %v998_v63  ;;  %v1270_v2 = vadd.f32 %v1269_v38, %v1268_v61  ;;  %v990_v3 = vadd.f32 %v989_v41, %v829_v0 }
 0x148   : > { %v1271_v5 = vpop.f32.mrf.mxu0  ;;  %v1351_v7 = vpop.f32.mrf.mxu1 }
 0x149   : > { %1025 = vst.msk [vmem:[%s1651_s8 + $0xa8] sm:$0xff] %vm633_vm0, %v961_v1  ;;  %v805_v8 = vadd.f32 %v1270_v2, %v1645_v42  ;;  %1032 = vst.msk [vmem:[%s1651_s8 + $0xe0] sm:$0xff] %vm633_vm0, %v990_v3  ;;  %v1001_v26 = vadd.f32 %v1351_v7, %v840_v4 }
 0x14a   : > { %v1272_v10 = vpop.f32.mrf.mxu0  ;;  %v992_v12 = vpop.f32.mrf.mxu1 }
 0x14b   : > { %v966_v13 = vadd.f32 %v1701_v20, %v805_v8  ;;  %1035 = vst.msk [vmem:[%s1651_s8 + $0xf8] sm:$0xff] %vm633_vm0, %v1001_v26  ;;  %v1273_v14 = vadd.f32 %v1272_v10, %v1271_v5  ;;  %v993_v15 = vadd.f32 %v992_v12, %v832_v9 }
 0x14d   : > { %1026 = vst.msk [vmem:[%s1651_s8 + $0xb0] sm:$0xff] %vm633_vm0, %v966_v13  ;;  %v808_v17 = vadd.f32 %v1273_v14, %v1645_v42  ;;  %1033 = vst.msk [vmem:[%s1651_s8 + $0xe8] sm:$0xff] %vm633_vm0, %v993_v15 }
 0x14f   : > { %v969_v18 = vadd.f32 %v1706_v29, %v808_v17 }
 0x151   : > { %1027 = vst.msk [vmem:[%s1651_s8 + $0xb8] sm:$0xff] %vm633_vm0, %v969_v18 }
 0x152 PF: > { %s13_s12 = sadd.s32 1, %s1465_s12  }
 0x153   : > { %p10_p4 = scmp.ge.s32.totalorder %s13_s12, 4  }
 0x155   :  { %12 = sbr.rel (!%p10_p4) target bundleno = 1 (0x1), region = 62 }

// kernel: gau_forward.14
= control target key start
LH: loop header
LB: loop body
LE: loop exit
PB: predicated region body
PF: predicated region fallthrough
CT: control target
= control target key end

     0   :  { %vm343_vm0 = vcmask 261120   ;;  %s718_s1 = inlined_call_operand.vmem [shape: bf16[256,32], index: 1, kind: input, shape index: {}]   ;;  %s719_s0 = inlined_call_operand.vmem [shape: bf16[128,256], index: 0, kind: input, shape index: {}]   ;;  %s720_s2 = inlined_call_operand.vmem [shape: f32[1,32], index: 2, kind: input, shape index: {}]   ;;  %s721_s3 = inlined_call_operand.vmem [shape: f32[128,32], index: 3, kind: output, shape index: {}]  }
   0x1   :  { %v477_v0 = vld [vmem:[%s718_s1 + $0x78] sm:$0xff]   ;;  %v479_v2 = vld [vmem:[%s718_s1 + $0x70] sm:$0xff]   ;;  %v481_v4 = vld [vmem:[%s718_s1 + $0x68] sm:$0xff]  }
   0x2   :  { %v478_v1 = vld [vmem:[%s718_s1 + $0x38] sm:$0xff]   ;;  %397 = vmatprep.subr.bf16.mxu0 %v477_v0  ;;  %461 = vmatprep.subr.bf16.mxu1 %v477_v0  ;;  %v480_v3 = vld [vmem:[%s718_s1 + $0x30] sm:$0xff]   ;;  %v482_v5 = vld [vmem:[%s718_s1 + $0x28] sm:$0xff]  }
   0x3   :  { %398 = vmatpush3.bf16.msra.mxu0 %v478_v1  ;;  %469 = vmatpush3.bf16.msra.mxu1 %v478_v1  ;;  %v483_v6 = vld [vmem:[%s718_s1 + $0x60] sm:$0xff]   ;;  %v485_v8 = vld [vmem:[%s718_s1 + $0x58] sm:$0xff]   ;;  %v487_v10 = vld [vmem:[%s718_s1 + $0x50] sm:$0xff]  }
   0x4   :  { %399 = vmatprep.subr.bf16.mxu0 %v479_v2  ;;  %462 = vmatprep.subr.bf16.mxu1 %v479_v2  ;;  %v484_v7 = vld [vmem:[%s718_s1 + $0x20] sm:$0xff]   ;;  %v486_v9 = vld [vmem:[%s718_s1 + $0x18] sm:$0xff]   ;;  %v488_v13 = vld [vmem:[%s718_s1 + $0x10] sm:$0xff]  }
   0x5   :  { %v495_v11 = vld [vmem:[%s719_s0 + $0x4] ss:$8 sps:$4 sm:$0xff]   ;;  %v493_v18 = vld [vmem:[%s719_s0] ss:$8 sps:$4 sm:$0xff]   ;;  %v499_v20 = vld [vmem:[%s719_s0 + $0x14] ss:$8 sps:$4 sm:$0xff]  }
   0x6   :  { %v498_v12 = vld [vmem:[%s719_s0 + $0x44] ss:$8 sps:$4 sm:$0xff]   ;;  %278 = vmatprep.mubr.bf16.mxu0 %v495_v11  ;;  %v496_v19 = vld [vmem:[%s719_s0 + $0x40] ss:$8 sps:$4 sm:$0xff]   ;;  %v501_v21 = vld [vmem:[%s719_s0 + $0x54] ss:$8 sps:$4 sm:$0xff]  }
   0x7   :  { %400 = vmatpush3.bf16.msra.mxu0 %v480_v3  ;;  %470 = vmatpush3.bf16.msra.mxu1 %v480_v3  ;;  %v489_v14 = vld [vmem:[%s718_s1 + $0x48] sm:$0xff]   ;;  %v491_v16 = vld [vmem:[%s718_s1 + $0x40] sm:$0xff]   ;;  %v503_v22 = vld [vmem:[%s719_s0 + $0x10] ss:$8 sps:$4 sm:$0xff]  }
   0x8   :  { %401 = vmatprep.subr.bf16.mxu0 %v481_v4  ;;  %463 = vmatprep.subr.bf16.mxu1 %v481_v4  ;;  %v490_v15 = vld [vmem:[%s718_s1 + $0x8] sm:$0xff]   ;;  %v492_v17 = vld [vmem:[%s718_s1] sm:$0xff]   ;;  %v504_v23 = vld [vmem:[%s719_s0 + $0x50] ss:$8 sps:$4 sm:$0xff]  }
   0x9   :  { %310 = vmatprep.mubr.bf16.mxu1 %v498_v12  ;;  %v505_v24 = vld [vmem:[%s719_s0 + $0x24] ss:$8 sps:$4 sm:$0xff]   ;;  %v509_v26 = vld [vmem:[%s719_s0 + $0x20] ss:$8 sps:$4 sm:$0xff]   ;;  %v511_v28 = vld [vmem:[%s719_s0 + $0x34] ss:$8 sps:$4 sm:$0xff]  }
   0xa   :  { %v507_v25 = vld [vmem:[%s719_s0 + $0x64] ss:$8 sps:$4 sm:$0xff]   ;;  %v510_v27 = vld [vmem:[%s719_s0 + $0x60] ss:$8 sps:$4 sm:$0xff]   ;;  %v513_v29 = vld [vmem:[%s719_s0 + $0x74] ss:$8 sps:$4 sm:$0xff]  }
   0xb   :  { %402 = vmatpush3.bf16.msra.mxu0 %v482_v5  ;;  %471 = vmatpush3.bf16.msra.mxu1 %v482_v5  ;;  %v515_v30 = vld [vmem:[%s719_s0 + $0x30] ss:$8 sps:$4 sm:$0xff]   ;;  %v636_v34 = vld [vmem:[%s720_s2] ss:$0 sm:$0xff] }
   0xc   :  { %403 = vmatprep.subr.bf16.mxu0 %v483_v6  ;;  %464 = vmatprep.subr.bf16.mxu1 %v483_v6  ;;  %v516_v31 = vld [vmem:[%s719_s0 + $0x70] ss:$8 sps:$4 sm:$0xff]  }
   0xf   :  { %404 = vmatpush3.bf16.msra.mxu0 %v484_v7  ;;  %472 = vmatpush3.bf16.msra.mxu1 %v484_v7 }
  0x10   :  { %405 = vmatprep.subr.bf16.mxu0 %v485_v8  ;;  %465 = vmatprep.subr.bf16.mxu1 %v485_v8 }
  0x13   :  { %406 = vmatpush3.bf16.msra.mxu0 %v486_v9  ;;  %473 = vmatpush3.bf16.msra.mxu1 %v486_v9 }
  0x14   :  { %407 = vmatprep.subr.bf16.mxu0 %v487_v10  ;;  %466 = vmatprep.subr.bf16.mxu1 %v487_v10 }
  0x17   :  { %408 = vmatpush3.bf16.msra.mxu0 %v488_v13  ;;  %474 = vmatpush3.bf16.msra.mxu1 %v488_v13 }
  0x18   :  { %409 = vmatprep.subr.bf16.mxu0 %v489_v14  ;;  %467 = vmatprep.subr.bf16.mxu1 %v489_v14 }
  0x1b   :  { %410 = vmatpush3.bf16.msra.mxu0 %v490_v15  ;;  %475 = vmatpush3.bf16.msra.mxu1 %v490_v15 }
  0x1c   :  { %411 = vmatprep.subr.bf16.mxu0 %v491_v16  ;;  %468 = vmatprep.subr.bf16.mxu1 %v491_v16 }
  0x1f   :  { %412 = vmatpush3.bf16.msra.mxu0 %v492_v17  ;;  %476 = vmatpush3.bf16.msra.mxu1 %v492_v17 }
  0x22   :  { %279 = vmatmul.mubr.bf16.vlgmr.msra.gmra.mxu0 %v493_v18  ;;  %311 = vmatmul.mubr.bf16.vlgmr.msra.gmra.mxu1 %v496_v19 }
  0x23   :  { %286 = vmatprep.mubr.bf16.mxu0 %v499_v20  ;;  %318 = vmatprep.mubr.bf16.mxu1 %v501_v21 }
  0x2a   :  { %287 = vmatmul.mubr.bf16.gmra.mxu0 %v503_v22  ;;  %319 = vmatmul.mubr.bf16.gmra.mxu1 %v504_v23 }
  0x2b   :  { %294 = vmatprep.mubr.bf16.mxu0 %v505_v24  ;;  %326 = vmatprep.mubr.bf16.mxu1 %v507_v25 }
  0x32   :  { %295 = vmatmul.mubr.bf16.gmra.mxu0 %v509_v26  ;;  %327 = vmatmul.mubr.bf16.gmra.mxu1 %v510_v27 }
  0x33   :  { %302 = vmatprep.mubr.bf16.mxu0 %v511_v28  ;;  %334 = vmatprep.mubr.bf16.mxu1 %v513_v29 }
  0x3a   :  { %303 = vmatmul.mubr.bf16.gmra.mxu0 %v515_v30  ;;  %335 = vmatmul.mubr.bf16.gmra.mxu1 %v516_v31 }
  0xe2   :  { %v413_v32 = vpop.f32.mrf.mxu0  ;;  %v437_v33 = vpop.f32.mrf.mxu1 }
  0xe4   :  { %v414_v35 = vpop.f32.mrf.mxu0  ;;  %v438_v36 = vpop.f32.mrf.mxu1 }
  0xe5   :  { %v415_v37 = vadd.f32 %v414_v35, %v413_v32  ;;  %v439_v38 = vadd.f32 %v438_v36, %v437_v33 }
  0xe6   :  { %v416_v39 = vpop.f32.mrf.mxu0  ;;  %v440_v40 = vpop.f32.mrf.mxu1 }
  0xe7   :  { %v281_v41 = vadd.f32 %v415_v37, %v636_v34  ;;  %v313_v42 = vadd.f32 %v439_v38, %v636_v34 }
  0xe8   :  { %v417_v43 = vpop.f32.mrf.mxu0  ;;  %v441_v44 = vpop.f32.mrf.mxu1 }
  0xe9   :  { %344 = vst.msk [vmem:[%s721_s3] sm:$0xff] %vm343_vm0, %v281_v41  ;;  %352 = vst.msk [vmem:[%s721_s3 + $0x40] sm:$0xff] %vm343_vm0, %v313_v42  ;;  %v418_v45 = vadd.f32 %v417_v43, %v416_v39  ;;  %v442_v46 = vadd.f32 %v441_v44, %v440_v40 }
  0xea   :  { %v419_v47 = vpop.f32.mrf.mxu0  ;;  %v443_v48 = vpop.f32.mrf.mxu1 }
  0xeb   :  { %v284_v49 = vadd.f32 %v418_v45, %v636_v34  ;;  %v316_v50 = vadd.f32 %v442_v46, %v636_v34 }
  0xec   :  { %v420_v51 = vpop.f32.mrf.mxu0  ;;  %v444_v52 = vpop.f32.mrf.mxu1 }
  0xed   :  { %345 = vst.msk [vmem:[%s721_s3 + $0x8] sm:$0xff] %vm343_vm0, %v284_v49  ;;  %353 = vst.msk [vmem:[%s721_s3 + $0x48] sm:$0xff] %vm343_vm0, %v316_v50  ;;  %v421_v53 = vadd.f32 %v420_v51, %v419_v47  ;;  %v445_v54 = vadd.f32 %v444_v52, %v443_v48 }
  0xee   :  { %v422_v55 = vpop.f32.mrf.mxu0  ;;  %v446_v56 = vpop.f32.mrf.mxu1 }
  0xef   :  { %v289_v57 = vadd.f32 %v421_v53, %v636_v34  ;;  %v321_v58 = vadd.f32 %v445_v54, %v636_v34 }
  0xf0   :  { %v423_v59 = vpop.f32.mrf.mxu0  ;;  %v447_v60 = vpop.f32.mrf.mxu1 }
  0xf1   :  { %346 = vst.msk [vmem:[%s721_s3 + $0x10] sm:$0xff] %vm343_vm0, %v289_v57  ;;  %354 = vst.msk [vmem:[%s721_s3 + $0x50] sm:$0xff] %vm343_vm0, %v321_v58  ;;  %v424_v61 = vadd.f32 %v423_v59, %v422_v55  ;;  %v448_v62 = vadd.f32 %v447_v60, %v446_v56 }
  0xf2   :  { %v425_v63 = vpop.f32.mrf.mxu0  ;;  %v449_v0 = vpop.f32.mrf.mxu1 }
  0xf3   :  { %v292_v1 = vadd.f32 %v424_v61, %v636_v34  ;;  %v324_v2 = vadd.f32 %v448_v62, %v636_v34 }
  0xf4   :  { %v426_v3 = vpop.f32.mrf.mxu0  ;;  %v450_v4 = vpop.f32.mrf.mxu1 }
  0xf5   :  { %347 = vst.msk [vmem:[%s721_s3 + $0x18] sm:$0xff] %vm343_vm0, %v292_v1  ;;  %355 = vst.msk [vmem:[%s721_s3 + $0x58] sm:$0xff] %vm343_vm0, %v324_v2  ;;  %v427_v5 = vadd.f32 %v426_v3, %v425_v63  ;;  %v451_v6 = vadd.f32 %v450_v4, %v449_v0 }
  0xf6   :  { %v428_v7 = vpop.f32.mrf.mxu0  ;;  %v452_v8 = vpop.f32.mrf.mxu1 }
  0xf7   :  { %v297_v9 = vadd.f32 %v427_v5, %v636_v34  ;;  %v329_v10 = vadd.f32 %v451_v6, %v636_v34 }
  0xf8   :  { %v429_v11 = vpop.f32.mrf.mxu0  ;;  %v453_v12 = vpop.f32.mrf.mxu1 }
  0xf9   :  { %348 = vst.msk [vmem:[%s721_s3 + $0x20] sm:$0xff] %vm343_vm0, %v297_v9  ;;  %356 = vst.msk [vmem:[%s721_s3 + $0x60] sm:$0xff] %vm343_vm0, %v329_v10  ;;  %v430_v13 = vadd.f32 %v429_v11, %v428_v7  ;;  %v454_v14 = vadd.f32 %v453_v12, %v452_v8 }
  0xfa   :  { %v431_v15 = vpop.f32.mrf.mxu0  ;;  %v455_v16 = vpop.f32.mrf.mxu1 }
  0xfb   :  { %v300_v17 = vadd.f32 %v430_v13, %v636_v34  ;;  %v332_v18 = vadd.f32 %v454_v14, %v636_v34 }
  0xfc   :  { %v432_v19 = vpop.f32.mrf.mxu0  ;;  %v456_v20 = vpop.f32.mrf.mxu1 }
  0xfd   :  { %349 = vst.msk [vmem:[%s721_s3 + $0x28] sm:$0xff] %vm343_vm0, %v300_v17  ;;  %357 = vst.msk [vmem:[%s721_s3 + $0x68] sm:$0xff] %vm343_vm0, %v332_v18  ;;  %v433_v21 = vadd.f32 %v432_v19, %v431_v15  ;;  %v457_v22 = vadd.f32 %v456_v20, %v455_v16 }
  0xfe   :  { %v434_v23 = vpop.f32.mrf.mxu0  ;;  %v458_v24 = vpop.f32.mrf.mxu1 }
  0xff   :  { %v305_v25 = vadd.f32 %v433_v21, %v636_v34  ;;  %v337_v26 = vadd.f32 %v457_v22, %v636_v34 }
 0x100   :  { %v435_v27 = vpop.f32.mrf.mxu0  ;;  %v459_v28 = vpop.f32.mrf.mxu1 }
 0x101   :  { %350 = vst.msk [vmem:[%s721_s3 + $0x30] sm:$0xff] %vm343_vm0, %v305_v25  ;;  %358 = vst.msk [vmem:[%s721_s3 + $0x70] sm:$0xff] %vm343_vm0, %v337_v26  ;;  %v436_v29 = vadd.f32 %v435_v27, %v434_v23  ;;  %v460_v30 = vadd.f32 %v459_v28, %v458_v24 }
 0x103   :  { %v308_v31 = vadd.f32 %v436_v29, %v636_v34  ;;  %v340_v32 = vadd.f32 %v460_v30, %v636_v34 }
 0x105   :  { %351 = vst.msk [vmem:[%s721_s3 + $0x38] sm:$0xff] %vm343_vm0, %v308_v31  ;;  %359 = vst.msk [vmem:[%s721_s3 + $0x78] sm:$0xff] %vm343_vm0, %v340_v32 }

// kernel: gau_forward.8
= control target key start
LH: loop header
LB: loop body
LE: loop exit
PB: predicated region body
PF: predicated region fallthrough
CT: control target
= control target key end

     0   :  { %s230_s6 = smov 0   ;;  %s259_s0 = inlined_call_operand.vmem [shape: f32[2,64,64], index: 0, kind: input, shape index: {}]   ;;  %s260_s1 = inlined_call_operand.vmem [shape: f32[2,1,64], index: 1, kind: output, shape index: {}]  }
   0x1 LB: > { %s194_s7 = sadd.s32 4294967295, %s218_s6   ;;  %p198_p0 = scmp.ge.s32.totalorder %s218_s6, 1  ;;  %s218_s6 = sphi %s230_s6, %s11_s6  }
   0x2   : > { %p87_p1 = scmp.lt.s32.totalorder %s218_s6, 3 }
   0x4   : > { %p88_p2 = pnand %p198_p0, %p87_p1 }
   0x5   : > { %p105_p3 = scmp.lt.s32.totalorder (!%p88_p2), %s194_s7, 1 }
   0x6   : > { %91 = sbr.rel (%p88_p2) target bundleno = 45 (0x2d), region = 24 }
   0xb   : > { %s262_s7 = smov (!%p105_p3, %s194_s7), 1  ;;  %vm121_vm0 = vcmask 523264   ;;  %vm145_vm1 = vcmask 516096  }
   0xc   : > { %s203_s8 = sshll.u32 %s262_s7, 6  ;;  %s112_s14 = scalar_lea.vmem %s260_s1, %s262_s7 }
   0xd   : > { %s109_s11 = scalar_lea.vmem %s259_s0, %s203_s8 }
   0xe   : > { %v113_v0 = vld [vmem:[%s109_s11] sm:$0xff]  ;;  %v114_v1 = vld [vmem:[%s109_s11 + $0x8] sm:$0xff]  ;;  %v115_v2 = vld [vmem:[%s109_s11 + $0x10] sm:$0xff] }
   0xf   : > { %v116_v3 = vld [vmem:[%s109_s11 + $0x18] sm:$0xff]  ;;  %v122_v4 = vsel %vm121_vm0, %v113_v0, 0.0  ;;  %v123_v5 = vsel %vm121_vm0, %v114_v1, 0.0  ;;  %v125_v6 = vsel %vm121_vm0, %v115_v2, 0.0  ;;  %v117_v7 = vld [vmem:[%s109_s11 + $0x20] sm:$0xff]  ;;  %v118_v10 = vld [vmem:[%s109_s11 + $0x28] sm:$0xff] }
  0x10   : > { %v124_v8 = vadd.f32 %v123_v5, %v122_v4  ;;  %v127_v9 = vsel %vm121_vm0, %v116_v3, 0.0  ;;  %v129_v12 = vsel %vm121_vm0, %v117_v7, 0.0  ;;  %v119_v13 = vld [vmem:[%s109_s11 + $0x30] sm:$0xff]  ;;  %v131_v15 = vsel %vm121_vm0, %v118_v10, 0.0  ;;  %v120_v16 = vld [vmem:[%s109_s11 + $0x38] sm:$0xff] }
  0x11   : > { %v133_v18 = vsel %vm121_vm0, %v119_v13, 0.0  ;;  %v135_v20 = vsel %vm121_vm0, %v120_v16, 0.0 }
  0x12   : > { %v126_v11 = vadd.f32 %v125_v6, %v124_v8 }
  0x14   : > { %v128_v14 = vadd.f32 %v127_v9, %v126_v11 }
  0x16   : > { %v130_v17 = vadd.f32 %v129_v12, %v128_v14 }
  0x18   : > { %v132_v19 = vadd.f32 %v131_v15, %v130_v17 }
  0x1a   : > { %v134_v21 = vadd.f32 %v133_v18, %v132_v19 }
  0x1c   : > { %v136_v22 = vadd.f32 %v135_v20, %v134_v21 }
  0x1e   : > { %v137_v23 = vrot.slane %v136_v22, 4 }
  0x20   : > { %v138_v24 = vadd.f32 %v137_v23, %v136_v22 }
  0x22   : > { %v139_v25 = vrot.slane %v138_v24, 2 }
  0x24   : > { %v140_v26 = vadd.f32 %v139_v25, %v138_v24 }
  0x26   : > { %v141_v27 = vrot.slane %v140_v26, 1 }
  0x28   : > { %v142_v28 = vadd.f32 %v141_v27, %v140_v26 }
  0x2a   : > { %v144_v29 = vmul.f32 0.015625, %v142_v28 }
  0x2c   : > { %146 = vst.msk [vmem:[%s112_s14] sm:$0x1] %vm145_vm1, %v144_v29 }
  0x2d PF: > { %s11_s6 = sadd.s32 1, %s218_s6  }
  0x2e   : > { %p8_p4 = scmp.ge.s32.totalorder %s11_s6, 4  }
  0x30   :  { %10 = sbr.rel (!%p8_p4) target bundleno = 1 (0x1), region = 54 }

// kernel: gau_forward.9
= control target key start
LH: loop header
LB: loop body
LE: loop exit
PB: predicated region body
PF: predicated region fallthrough
CT: control target
= control target key end

     0   :  { %v135_v0 = vmov 0.0   ;;  %vm136_vm0 = vmmov 0   ;;  %vm55_vm1 = vcmask 523264   ;;  %vm100_vm2 = vcmask 261120   ;;  %s178_s1 = inlined_call_operand.vmem [shape: bf16[64,32], index: 1, kind: input, shape index: {}]   ;;  %s179_s0 = inlined_call_operand.vmem [shape: bf16[8,64], index: 0, kind: input, shape index: {}]   ;;  %s180_s2 = inlined_call_operand.vmem [shape: f32[1,32], index: 2, kind: input, shape index: {}]   ;;  %s181_s3 = inlined_call_operand.vmem [shape: f32[8,32], index: 3, kind: output, shape index: {}]  }
   0x1   :  { %117 = vmatprep.subr.bf16.mxu0 %v135_v0  ;;  %v131_v1 = vld [vmem:[%s178_s1 + $0x18] sm:$0xff]   ;;  %125 = vmatprep.mubr.msk.bf16.mxu0 %vm136_vm0, %v135_v0  ;;  %v132_v2 = vld [vmem:[%s178_s1 + $0x10] sm:$0xff]   ;;  %v133_v3 = vld [vmem:[%s178_s1 + $0x8] sm:$0xff]  }
   0x2   :  { %118 = vmatpush3.bf16.msra.mxu0 %v131_v1  ;;  %v134_v4 = vld [vmem:[%s178_s1] sm:$0xff]  }
   0x3   :  { %119 = vmatprep.subr.bf16.mxu0 %v135_v0  ;;  %v15_v5 = vld [vmem:[%s179_s0] sm:$0xf] }
   0x4   :  { %v106_v6 = vld [vmem:[%s180_s2] ss:$0 sm:$0xff] }
   0x6   :  { %120 = vmatpush3.bf16.msra.mxu0 %v132_v2 }
   0x7   :  { %121 = vmatprep.subr.bf16.mxu0 %v135_v0 }
   0xa   :  { %122 = vmatpush3.bf16.msra.mxu0 %v133_v3 }
   0xb   :  { %123 = vmatprep.subr.bf16.mxu0 %v135_v0 }
   0xe   :  { %124 = vmatpush3.bf16.msra.mxu0 %v134_v4 }
  0x11   :  { %126 = vmatmul.mubr.msk.bf16.vlgmr.msra.gmra.mxu0 %vm55_vm1, %v15_v5 }
  0xd1   :  { %v93_v7 = vpop.f32.mrf.mxu0 }
  0xd2   :  { %v94_v8 = vadd.f32 %v106_v6, %v93_v7 }
  0xd3   :  { %v127_v9 = vpop.f32.mrf.mxu0 }
  0xd4   :  { %v99_v10 = vmax.f32 %v94_v8, 0.0 }
  0xd5   :  { %v96_v11 = vpop.f32.mrf.mxu0 }
  0xd6   :  { %101 = vst.msk [vmem:[%s181_s3] sm:$0xff] %vm100_vm2, %v99_v10 }
  0xd7   :  { %v128_v12 = vpop.f32.mrf.mxu0 }

// kernel: gau_forward.15
= control target key start
LH: loop header
LB: loop body
LE: loop exit
PB: predicated region body
PF: predicated region fallthrough
CT: control target
= control target key end

     0   :  { %8 = vsyncpa [#allocation3], 0  ;;  %s1045_s0 = inlined_call_operand.vmem [shape: f32[2,256,32], index: 0, kind: input, shape index: {}]   ;;  %s1046_s1 = inlined_call_operand.vmem [shape: f32[2,256,32], index: 1, kind: input, shape index: {}]   ;;  %s1047_s2 = inlined_call_operand.vmem [shape: f32[2,1,32], index: 2, kind: input, shape index: {}]   ;;  %s1048_s3 = inlined_call_operand.hbm [shape: f32[2,256,32], index: 3, kind: output, shape index: {}]  }
   0x1   :  { %10 = vsyncpa [#allocation3 + $0x1], 0  ;;  %s749_s12 = smov 0   ;;  %s751_s13 = smov 0  }
   0x2   :  { %s753_s14 = smov 0   ;;  %s755_s15 = smov 0  }
   0x3   :  { %s757_s16 = smov 0   ;;  %s759_s17 = smov 0  }
   0x4 LB: > { %s572_s18 = sadd.s32 4294967295, %s724_s17   ;;  %s573_s19 = sadd.s32 4294967294, %s724_s17   ;;  %s724_s17 = sphi %s759_s17, %s16_s17   ;;  %s720_s16 = sphi %s757_s16, %s1055_s16   ;;  %s716_s15 = sphi %s755_s15, %s1054_s15   ;;  %s712_s14 = sphi %s753_s14, %s1053_s14   ;;  %s708_s13 = sphi %s751_s13, %s1052_s13   ;;  %s704_s12 = sphi %s749_s12, %s1051_s12  }
   0x5   : > { %s28_s20 = sadd.s32 1, %s720_s16  ;;  %s119_s21 = sadd.s32 1, %s712_s14 }
   0x6   : > { %p30_p0 = scmp.ge.s32.totalorder %s28_s20, 2  ;;  %p129_p1 = scmp.ne.s32.totalorder %s712_s14, %s708_s13 }
   0x7   : > { %p130_p2 = scmp.eq.s32.totalorder %s572_s18, 1  ;;  %p135_p3 = scmp.ne.s32.totalorder %s708_s13, %s704_s12 }
   0x8   : > { %s1057_s20 = smov (%p30_p0, %s28_s20), 0  ;;  %p136_p5 = scmp.eq.s32.totalorder %s573_s19, 1 }
   0x9   : > { %p789_p4 = por %p130_p2, %p129_p1  ;;  %s114_s23 = ssub.s32 %s720_s16, %s1057_s20 }
   0xa   : > { %p576_p6 = scmp.ge.s32.totalorder %s724_s17, 1  ;;  %p117_p7 = scmp.eq.s32.totalorder %s114_s23, 0 }
   0xb   : > { %p796_p8 = por %p136_p5, %p135_p3  ;;  %p186_p9 = scmp.lt.s32.totalorder %s724_s17, 3 }
   0xc   : > { %s802_s25 = scalar_select %p117_p7, %s712_s14, %s119_s21  }
   0xd   : > { %p187_p10 = pnand %p576_p6, %p186_p9 }
   0xe   : > { %p227_p11 = scmp.lt.s32.totalorder (!%p187_p10), %s716_s15, 1  ;;  %s223_s27 = sand.u32 (!%p187_p10), 1, %s708_s13  }
   0xf   : > { %190 = sbr.rel (%p187_p10) target bundleno = 68 (0x44), region = 32  ;;  %s827_s11 = sshll.u32 (!%p187_p10), %s223_s27, 8 }
  0x10   : > { %s856_s18 = scalar_lea.vmem (!%p187_p10), [#allocation2], %s827_s11  ;;  %s590_s19 = sshll.u32 (!%p187_p10), %s716_s15, 12 }
  0x11   : > { %s466_s21 = sshll.u32 (!%p187_p10), %s856_s18, 4  ;;  %s726_s30 = smov (!%p187_p10), [#allocation2]   ;;  %s990_s21 = int_to_ptr.vmem [resolvable:$true] %s466_s21 }
  0x12   : > { %s648_s29 = scalar_lea.vmem (!%p187_p10), %s990_s21, 4096 }
  0x13   : > { %p649_p12 = scmp.ne.s32.totalorder (!%p187_p10), %s990_s21, %s648_s29 }
  0x14   : > { %s228_s26 = scalar_select %p227_p11, %s716_s15, 1  ;;  %vm417_vm0 = vcmask 261120  }
  0x15   : > { %p650_p13 = pnand %p649_p12, %p789_p4 }
  0x16   : > { %s588_s28 = sshll.u32 %s228_s26, 8  ;;  %s248_s4 = scalar_lea.vmem %s1047_s2, %s228_s26 }
  0x17   : > { %s813_s7 = scalar_lea.vmem %s1045_s0, %s588_s28  ;;  %s818_s10 = scalar_lea.vmem %s1046_s1, %s588_s28  ;;  %v820_v0 = vld [vmem:[%s248_s4] ss:$0 sm:$0xff] }
  0x18   : > { %v250_v1 = vld [vmem:[%s813_s7] sm:$0xff]  ;;  %v251_v3 = vld [vmem:[%s813_s7 + $0x8] sm:$0xff]  ;;  %v252_v7 = vld [vmem:[%s813_s7 + $0x10] sm:$0xff]  ;;  %s988_s26 = scalar_lea.hbm %s1048_s3, %s590_s19  ;;  %s1000_s28 = scalar_lea.sflag [#allocation3], %s223_s27 }
  0x19   : > { %v321_v2 = vld [vmem:[%s818_s10] sm:$0xff]  ;;  %v289_v4 = vmul.f32 %v820_v0, %v250_v1  ;;  %v290_v5 = vmul.f32 %v820_v0, %v251_v3  ;;  %v322_v6 = vld [vmem:[%s818_s10 + $0x8] sm:$0xff]  ;;  %v323_v8 = vld [vmem:[%s818_s10 + $0x10] sm:$0xff]  ;;  %v291_v9 = vmul.f32 %v820_v0, %v252_v7  ;;  %p651_p0 = pneg %p650_p13  ;;  %s652_s4 = sshll.u32 %s726_s30, 4  ;;  %s653_s4 = int_to_ptr.vmem [resolvable:$false] %s652_s4 }
  0x1a   : > { %v253_v10 = vld [vmem:[%s813_s7 + $0x18] sm:$0xff]  ;;  %v254_v12 = vld [vmem:[%s813_s7 + $0x20] sm:$0xff]  ;;  %v255_v18 = vld [vmem:[%s813_s7 + $0x28] sm:$0xff]  ;;  %s654_s5 = scalar_lea.vmem %s653_s4, 8192  ;;  %p655_p1 = scmp.lt.s32.totalorder %s990_s21, %s653_s4 }
  0x1b   : > { %v324_v11 = vld [vmem:[%s818_s10 + $0x18] sm:$0xff]  ;;  %v353_v13 = vadd.f32 %v321_v2, %v289_v4  ;;  %v354_v14 = vadd.f32 %v322_v6, %v290_v5  ;;  %v292_v15 = vmul.f32 %v820_v0, %v253_v10  ;;  %v293_v16 = vmul.f32 %v820_v0, %v254_v12  ;;  %v325_v17 = vld [vmem:[%s818_s10 + $0x20] sm:$0xff]  ;;  %v326_v19 = vld [vmem:[%s818_s10 + $0x28] sm:$0xff]  ;;  %p656_p2 = scmp.lt.s32.totalorder %s654_s5, %s648_s29 }
  0x1c   : > { %v355_v20 = vadd.f32 %v323_v8, %v291_v9  ;;  %v294_v21 = vmul.f32 %v820_v0, %v255_v18  ;;  %v256_v22 = vld [vmem:[%s813_s7 + $0x30] sm:$0xff]  ;;  %v257_v24 = vld [vmem:[%s813_s7 + $0x38] sm:$0xff]  ;;  %v258_v30 = vld [vmem:[%s813_s7 + $0x40] sm:$0xff] }
  0x1d   : > { %v327_v23 = vld [vmem:[%s818_s10 + $0x30] sm:$0xff]  ;;  %v385_v25 = vmax.f32 %v353_v13, 0.0  ;;  %v386_v26 = vmax.f32 %v354_v14, 0.0  ;;  %v356_v27 = vadd.f32 %v324_v11, %v292_v15  ;;  %v357_v28 = vadd.f32 %v325_v17, %v293_v16  ;;  %v328_v29 = vld [vmem:[%s818_s10 + $0x38] sm:$0xff]  ;;  %v329_v31 = vld [vmem:[%s818_s10 + $0x40] sm:$0xff]  ;;  %p657_p3 = por %p656_p2, %p655_p1 }
  0x1e   : > { %v387_v32 = vmax.f32 %v355_v20, 0.0  ;;  %v358_v33 = vadd.f32 %v326_v19, %v294_v21  ;;  %v295_v34 = vmul.f32 %v820_v0, %v256_v22  ;;  %v296_v35 = vmul.f32 %v820_v0, %v257_v24  ;;  %v259_v36 = vld [vmem:[%s813_s7 + $0x48] sm:$0xff]  ;;  %v260_v38 = vld [vmem:[%s813_s7 + $0x50] sm:$0xff]  ;;  %v261_v44 = vld [vmem:[%s813_s7 + $0x58] sm:$0xff] }
  0x1f   : > { %v330_v37 = vld [vmem:[%s818_s10 + $0x48] sm:$0xff]  ;;  %418 = vst.msk [vmem:[%s856_s18] sm:$0xff] %vm417_vm0, %v385_v25  ;;  %419 = vst.msk [vmem:[%s856_s18 + $0x8] sm:$0xff] %vm417_vm0, %v386_v26  ;;  %v388_v39 = vmax.f32 %v356_v27, 0.0  ;;  %v389_v40 = vmax.f32 %v357_v28, 0.0  ;;  %v297_v41 = vmul.f32 %v820_v0, %v258_v30  ;;  %v298_v42 = vmul.f32 %v820_v0, %v259_v36  ;;  %v331_v43 = vld [vmem:[%s818_s10 + $0x50] sm:$0xff]  ;;  %p658_p5 = pnand %p657_p3, %p651_p0 }
  0x20   : > { %v332_v45 = vld [vmem:[%s818_s10 + $0x58] sm:$0xff]  ;;  %420 = vst.msk [vmem:[%s856_s18 + $0x10] sm:$0xff] %vm417_vm0, %v387_v32  ;;  %v390_v46 = vmax.f32 %v358_v33, 0.0  ;;  %v359_v47 = vadd.f32 %v327_v23, %v295_v34  ;;  %v360_v48 = vadd.f32 %v328_v29, %v296_v35  ;;  %v299_v49 = vmul.f32 %v820_v0, %v260_v38  ;;  %v262_v50 = vld [vmem:[%s813_s7 + $0x60] sm:$0xff]  ;;  %v263_v52 = vld [vmem:[%s813_s7 + $0x68] sm:$0xff] }
  0x21   : > { %v333_v51 = vld [vmem:[%s818_s10 + $0x60] sm:$0xff]  ;;  %421 = vst.msk [vmem:[%s856_s18 + $0x18] sm:$0xff] %vm417_vm0, %v388_v39  ;;  %422 = vst.msk [vmem:[%s856_s18 + $0x20] sm:$0xff] %vm417_vm0, %v389_v40  ;;  %v361_v53 = vadd.f32 %v329_v31, %v297_v41  ;;  %v362_v54 = vadd.f32 %v330_v37, %v298_v42  ;;  %v300_v55 = vmul.f32 %v820_v0, %v261_v44  ;;  %v334_v57 = vld [vmem:[%s818_s10 + $0x68] sm:$0xff] }
  0x22   : > { %v301_v56 = vmul.f32 %v820_v0, %v262_v50  ;;  %v264_v58 = vld [vmem:[%s813_s7 + $0x70] sm:$0xff]  ;;  %423 = vst.msk [vmem:[%s856_s18 + $0x28] sm:$0xff] %vm417_vm0, %v390_v46  ;;  %v391_v59 = vmax.f32 %v359_v47, 0.0  ;;  %v392_v60 = vmax.f32 %v360_v48, 0.0  ;;  %v363_v61 = vadd.f32 %v331_v43, %v299_v49  ;;  %v265_v1 = vld [vmem:[%s813_s7 + $0x78] sm:$0xff]  ;;  %v266_v2 = vld [vmem:[%s813_s7 + $0x80] sm:$0xff] }
  0x23   : > { %v302_v62 = vmul.f32 %v820_v0, %v263_v52  ;;  %v335_v63 = vld [vmem:[%s818_s10 + $0x70] sm:$0xff]  ;;  %v393_v3 = vmax.f32 %v361_v53, 0.0  ;;  %v394_v4 = vmax.f32 %v362_v54, 0.0  ;;  %v364_v5 = vadd.f32 %v332_v45, %v300_v55  ;;  %v336_v7 = vld [vmem:[%s818_s10 + $0x78] sm:$0xff]  ;;  %v337_v8 = vld [vmem:[%s818_s10 + $0x80] sm:$0xff] }
  0x24   : > { %v365_v6 = vadd.f32 %v333_v51, %v301_v56  ;;  %v267_v9 = vld [vmem:[%s813_s7 + $0x88] sm:$0xff]  ;;  %424 = vst.msk [vmem:[%s856_s18 + $0x30] sm:$0xff] %vm417_vm0, %v391_v59  ;;  %425 = vst.msk [vmem:[%s856_s18 + $0x38] sm:$0xff] %vm417_vm0, %v392_v60  ;;  %v395_v10 = vmax.f32 %v363_v61, 0.0  ;;  %v303_v12 = vmul.f32 %v820_v0, %v264_v58  ;;  %v304_v13 = vmul.f32 %v820_v0, %v265_v1  ;;  %v268_v15 = vld [vmem:[%s813_s7 + $0x90] sm:$0xff] }
  0x25   : > { %v366_v11 = vadd.f32 %v334_v57, %v302_v62  ;;  %v338_v14 = vld [vmem:[%s818_s10 + $0x88] sm:$0xff]  ;;  %v269_v16 = vld [vmem:[%s813_s7 + $0x98] sm:$0xff]  ;;  %426 = vst.msk [vmem:[%s856_s18 + $0x40] sm:$0xff] %vm417_vm0, %v393_v3  ;;  %427 = vst.msk [vmem:[%s856_s18 + $0x48] sm:$0xff] %vm417_vm0, %v394_v4  ;;  %v396_v17 = vmax.f32 %v364_v5, 0.0  ;;  %v305_v19 = vmul.f32 %v820_v0, %v266_v2  ;;  %v306_v20 = vmul.f32 %v820_v0, %v267_v9 }
  0x26   : > { %v397_v18 = vmax.f32 %v365_v6, 0.0  ;;  %v339_v21 = vld [vmem:[%s818_s10 + $0x90] sm:$0xff]  ;;  %v270_v22 = vld [vmem:[%s813_s7 + $0xa0] sm:$0xff]  ;;  %428 = vst.msk [vmem:[%s856_s18 + $0x50] sm:$0xff] %vm417_vm0, %v395_v10  ;;  %v367_v24 = vadd.f32 %v335_v63, %v303_v12  ;;  %v368_v25 = vadd.f32 %v336_v7, %v304_v13  ;;  %v307_v26 = vmul.f32 %v820_v0, %v268_v15  ;;  %v340_v27 = vld [vmem:[%s818_s10 + $0x98] sm:$0xff] }
  0x27   : > { %v398_v23 = vmax.f32 %v366_v11, 0.0  ;;  %v341_v28 = vld [vmem:[%s818_s10 + $0xa0] sm:$0xff]  ;;  %v271_v29 = vld [vmem:[%s813_s7 + $0xa8] sm:$0xff]  ;;  %429 = vst.msk [vmem:[%s856_s18 + $0x58] sm:$0xff] %vm417_vm0, %v396_v17  ;;  %v369_v30 = vadd.f32 %v337_v8, %v305_v19  ;;  %v370_v31 = vadd.f32 %v338_v14, %v306_v20  ;;  %v308_v32 = vmul.f32 %v820_v0, %v269_v16  ;;  %v272_v35 = vld [vmem:[%s813_s7 + $0xb0] sm:$0xff] }
  0x28   : > { %430 = vst.msk [vmem:[%s856_s18 + $0x60] sm:$0xff] %vm417_vm0, %v397_v18  ;;  %v309_v33 = vmul.f32 %v820_v0, %v270_v22  ;;  %v342_v34 = vld [vmem:[%s818_s10 + $0xa8] sm:$0xff]  ;;  %v273_v36 = vld [vmem:[%s813_s7 + $0xb8] sm:$0xff]  ;;  %v399_v37 = vmax.f32 %v367_v24, 0.0  ;;  %v400_v38 = vmax.f32 %v368_v25, 0.0  ;;  %v371_v39 = vadd.f32 %v339_v21, %v307_v26  ;;  %v343_v41 = vld [vmem:[%s818_s10 + $0xb0] sm:$0xff] }
  0x29   : > { %431 = vst.msk [vmem:[%s856_s18 + $0x68] sm:$0xff] %vm417_vm0, %v398_v23  ;;  %v310_v40 = vmul.f32 %v820_v0, %v271_v29  ;;  %v274_v42 = vld [vmem:[%s813_s7 + $0xc0] sm:$0xff]  ;;  %v275_v43 = vld [vmem:[%s813_s7 + $0xc8] sm:$0xff]  ;;  %v401_v44 = vmax.f32 %v369_v30, 0.0  ;;  %v402_v45 = vmax.f32 %v370_v31, 0.0  ;;  %v372_v46 = vadd.f32 %v340_v27, %v308_v32  ;;  %v344_v48 = vld [vmem:[%s818_s10 + $0xb8] sm:$0xff] }
  0x2a   : > { %v373_v47 = vadd.f32 %v341_v28, %v309_v33  ;;  %v345_v49 = vld [vmem:[%s818_s10 + $0xc0] sm:$0xff]  ;;  %v276_v50 = vld [vmem:[%s813_s7 + $0xd0] sm:$0xff]  ;;  %432 = vst.msk [vmem:[%s856_s18 + $0x70] sm:$0xff] %vm417_vm0, %v399_v37  ;;  %433 = vst.msk [vmem:[%s856_s18 + $0x78] sm:$0xff] %vm417_vm0, %v400_v38  ;;  %v403_v51 = vmax.f32 %v371_v39, 0.0  ;;  %v311_v53 = vmul.f32 %v820_v0, %v272_v35  ;;  %v312_v54 = vmul.f32 %v820_v0, %v273_v36 }
  0x2b   : > { %v374_v52 = vadd.f32 %v342_v34, %v310_v40  ;;  %v346_v55 = vld [vmem:[%s818_s10 + $0xc8] sm:$0xff]  ;;  %v277_v56 = vld [vmem:[%s813_s7 + $0xd8] sm:$0xff]  ;;  %v278_v57 = vld [vmem:[%s813_s7 + $0xe0] sm:$0xff]  ;;  %434 = vst.msk [vmem:[%s856_s18 + $0x80] sm:$0xff] %vm417_vm0, %v401_v44  ;;  %v404_v58 = vmax.f32 %v372_v46, 0.0  ;;  %v313_v60 = vmul.f32 %v820_v0, %v274_v42  ;;  %v314_v61 = vmul.f32 %v820_v0, %v275_v43 }
  0x2c   : > { %435 = vst.msk [vmem:[%s856_s18 + $0x88] sm:$0xff] %vm417_vm0, %v402_v45  ;;  %v405_v59 = vmax.f32 %v373_v47, 0.0  ;;  %v347_v62 = vld [vmem:[%s818_s10 + $0xd0] sm:$0xff]  ;;  %v279_v63 = vld [vmem:[%s813_s7 + $0xe8] sm:$0xff]  ;;  %436 = vst.msk [vmem:[%s856_s18 + $0x90] sm:$0xff] %vm417_vm0, %v403_v51  ;;  %v375_v2 = vadd.f32 %v343_v41, %v311_v53  ;;  %v376_v3 = vadd.f32 %v344_v48, %v312_v54  ;;  %v315_v4 = vmul.f32 %v820_v0, %v276_v50 }
  0x2d   : > { %v406_v1 = vmax.f32 %v374_v52, 0.0  ;;  %v348_v5 = vld [vmem:[%s818_s10 + $0xd8] sm:$0xff]  ;;  %v349_v6 = vld [vmem:[%s818_s10 + $0xe0] sm:$0xff]  ;;  %437 = vst.msk [vmem:[%s856_s18 + $0x98] sm:$0xff] %vm417_vm0, %v404_v58  ;;  %v377_v7 = vadd.f32 %v345_v49, %v313_v60  ;;  %v378_v8 = vadd.f32 %v346_v55, %v314_v61  ;;  %v316_v9 = vmul.f32 %v820_v0, %v277_v56  ;;  %v350_v11 = vld [vmem:[%s818_s10 + $0xe8] sm:$0xff] }
  0x2e   : > { %438 = vst.msk [vmem:[%s856_s18 + $0xa0] sm:$0xff] %vm417_vm0, %v405_v59  ;;  %v317_v10 = vmul.f32 %v820_v0, %v278_v57  ;;  %v280_v12 = vld [vmem:[%s813_s7 + $0xf0] sm:$0xff]  ;;  %v281_v13 = vld [vmem:[%s813_s7 + $0xf8] sm:$0xff]  ;;  %v407_v14 = vmax.f32 %v375_v2, 0.0  ;;  %v408_v15 = vmax.f32 %v376_v3, 0.0  ;;  %v379_v16 = vadd.f32 %v347_v62, %v315_v4 }
  0x2f   : > { %439 = vst.msk [vmem:[%s856_s18 + $0xa8] sm:$0xff] %vm417_vm0, %v406_v1  ;;  %v318_v17 = vmul.f32 %v820_v0, %v279_v63  ;;  %v409_v18 = vmax.f32 %v377_v7, 0.0  ;;  %v410_v19 = vmax.f32 %v378_v8, 0.0  ;;  %v380_v20 = vadd.f32 %v348_v5, %v316_v9  ;;  %v351_v22 = vld [vmem:[%s818_s10 + $0xf0] sm:$0xff]  ;;  %v352_v23 = vld [vmem:[%s818_s10 + $0xf8] sm:$0xff] }
  0x30   : > { %v381_v21 = vadd.f32 %v349_v6, %v317_v10  ;;  %440 = vst.msk [vmem:[%s856_s18 + $0xb0] sm:$0xff] %vm417_vm0, %v407_v14  ;;  %441 = vst.msk [vmem:[%s856_s18 + $0xb8] sm:$0xff] %vm417_vm0, %v408_v15  ;;  %v411_v24 = vmax.f32 %v379_v16, 0.0  ;;  %v319_v26 = vmul.f32 %v820_v0, %v280_v12  ;;  %v320_v27 = vmul.f32 %v820_v0, %v281_v13 }
  0x31   : > { %v382_v25 = vadd.f32 %v350_v11, %v318_v17  ;;  %442 = vst.msk [vmem:[%s856_s18 + $0xc0] sm:$0xff] %vm417_vm0, %v409_v18  ;;  %443 = vst.msk [vmem:[%s856_s18 + $0xc8] sm:$0xff] %vm417_vm0, %v410_v19  ;;  %v412_v28 = vmax.f32 %v380_v20, 0.0 }
  0x32   : > { %v413_v29 = vmax.f32 %v381_v21, 0.0  ;;  %444 = vst.msk [vmem:[%s856_s18 + $0xd0] sm:$0xff] %vm417_vm0, %v411_v24  ;;  %v383_v31 = vadd.f32 %v351_v22, %v319_v26  ;;  %v384_v32 = vadd.f32 %v352_v23, %v320_v27 }
  0x33   : > { %v414_v30 = vmax.f32 %v382_v25, 0.0  ;;  %445 = vst.msk [vmem:[%s856_s18 + $0xd8] sm:$0xff] %vm417_vm0, %v412_v28 }
  0x34   : > { %446 = vst.msk [vmem:[%s856_s18 + $0xe0] sm:$0xff] %vm417_vm0, %v413_v29  ;;  %v415_v0 = vmax.f32 %v383_v31, 0.0  ;;  %v416_v33 = vmax.f32 %v384_v32, 0.0 }
  0x35   : > { %447 = vst.msk [vmem:[%s856_s18 + $0xe8] sm:$0xff] %vm417_vm0, %v414_v30 }
  0x36   : > { %448 = vst.msk [vmem:[%s856_s18 + $0xf0] sm:$0xff] %vm417_vm0, %v415_v0  ;;  %449 = vst.msk [vmem:[%s856_s18 + $0xf8] sm:$0xff] %vm417_vm0, %v416_v33 }
  0x37   : > { %661 = shalt.err (!%p658_p5)
}
  0x38   : > { %s662_s27 = scalar_lea.hbm %s988_s26, 4096  ;;  %s666_s8 = scalar_lea.hbm %s1048_s3, 8192 }
  0x39   : > { %p663_p6 = scmp.ne.s32.totalorder %s988_s26, %s662_s27  ;;  %p667_p10 = scmp.lt.s32.totalorder %s988_s26, %s1048_s3 }
  0x3a   : > { %p668_p11 = scmp.lt.s32.totalorder %s666_s8, %s662_s27 }
  0x3b   : > { %p664_p7 = pnand %p663_p6, %p789_p4 }
  0x3c   : > { %p669_p12 = por %p668_p11, %p667_p10 }
  0x3d   : > { %p665_p9 = pneg %p664_p7 }
  0x3f   : > { %p670_p13 = pnand %p669_p12, %p665_p9 }
  0x41   : > { %673 = shalt.err (!%p670_p13)
}
  0x42   : > { %s727_s11 = smov 128   ;;  %s728_s18 = smov 8  }
  0x43   : > { %591 = dma.vmem_to_hbm [thread:$0]  (%p789_p4), %s990_s21, 4096, %s988_s26, %s1000_s28, %s727_s11, %s727_s11, %s728_s18  }
  0x44 PF: > { %p597_p0 = scmp.ge.s32.totalorder %s724_s17, 2  ;;  %s481_s19 = sand.u32 1, %s704_s12  }
  0x45   : > { %s482_s15 = scalar_lea.sflag [#allocation3], %s481_s19 }
  0x46   : > { %p594_p1 = pnand %p597_p0, %p796_p8 }
  0x48   : > { %p595_p2 = pneg %p594_p1 }
  0x4a   : > { %699 = dma.done.wait (%p595_p2), %s482_s15, 4096  }
  0x4b   : > { %701 = vsyncadd (%p595_p2), %s482_s15, 4294963200  ;;  %s16_s17 = sadd.s32 1, %s724_s17   ;;  %s1051_s12 = smov %s708_s13 }
  0x4c   : > { %p13_p3 = scmp.ge.s32.totalorder %s16_s17, 4   ;;  %s1052_s13 = smov %s712_s14 }
  0x4d   : > { %s1053_s14 = smov %s802_s25  ;;  %s1054_s15 = smov %s720_s16 }
  0x4e   : > { %s1055_s16 = smov %s1057_s20  ;;  %15 = sbr.rel (!%p13_p3) target bundleno = 4 (0x4), region = 73 }
  0x53   :  { %487 = vsyncpa [#allocation3], 1 }
  0x54   :  { %489 = vsyncpa [#allocation3 + $0x1], 1 }

</bundles_post_ra>
